<compile_context>
chip_gen: v6e
topology: v6e:2x2x1
jax: 0.10.0
libtpu: 0.0.40
codegen_flags: <defaults>
</compile_context>

<pallas_src>
import math
import functools

import jax
import jax.numpy as jnp
import numpy as np
from jax.experimental import pallas as pl
from jax.experimental.pallas import tpu as pltpu


def _attention_kernel(xq_ref, xk_ref, xv_ref,
                      wqkv_ref, bqkv_ref, wp_ref, bp_ref,
                      o_ref, *, heads, d_k, n, slabs):
    """One grid step: `slabs` (b,t)-slabs, rows = slabs * n, d = heads * d_k."""
    d = heads * d_k
    rows = slabs * n

    # Activations arrive f32; cast to bf16 in-kernel (VPU work hidden under MXU slack).
    xq = xq_ref[...].astype(jnp.bfloat16)      # (rows, d)
    xk = xk_ref[...].astype(jnp.bfloat16)
    xv = xv_ref[...].astype(jnp.bfloat16)

    # Fused-M linear layers: bf16 operands, f32 accumulation.
    # 1/sqrt(d_k) is already folded into wqkv[0]/bqkv[0] at pack time.
    q = jnp.dot(xq, wqkv_ref[0], preferred_element_type=jnp.float32) + bqkv_ref[0]
    k = jnp.dot(xk, wqkv_ref[1], preferred_element_type=jnp.float32) + bqkv_ref[1]
    v = jnp.dot(xv, wqkv_ref[2], preferred_element_type=jnp.float32) + bqkv_ref[2]

    # Per-head attention (batched over slabs) with the head-merge folded into the
    # output projection: acc += ctx_h @ Wp[h]  (no concat over heads).
    acc = jnp.zeros((rows, d), jnp.float32)
    for h in range(heads):
        sl = slice(h * d_k, (h + 1) * d_k)
        qh = q[:, sl].astype(jnp.bfloat16).reshape(slabs, n, d_k)   # leading-dim split
        kh = k[:, sl].astype(jnp.bfloat16).reshape(slabs, n, d_k)
        vh = v[:, sl].astype(jnp.bfloat16).reshape(slabs, n, d_k)

        s = jnp.einsum("bnd,bmd->bnm", qh, kh,
                       preferred_element_type=jnp.float32)          # (slabs, n, n) f32
        s = s - jnp.max(s, axis=-1, keepdims=True)
        p = jnp.exp(s)
        p = p * pl.reciprocal(jnp.sum(p, axis=-1, keepdims=True), approx=True)

        ctx = jnp.einsum("bnm,bmd->bnd", p.astype(jnp.bfloat16), vh,
                         preferred_element_type=jnp.float32)         # (slabs, n, d_k)
        acc = acc + jnp.dot(ctx.reshape(rows, d_k).astype(jnp.bfloat16), wp_ref[h],
                            preferred_element_type=jnp.float32)      # (rows, d)

    o_ref[...] = (acc + bp_ref[...]).astype(o_ref.dtype)


def _choose_slab_block(bt, n):
    """(b,t)-slabs per grid step.

    Small problems: a single grid step (per-step pipeline overhead ~0.35us dominates;
    on v5e/v6e the grid is a serial loop so splitting has zero upside).
    Large problems: target ~2K rows per step (amortises per-step overhead, keeps f32
    intermediates comfortably inside v7x's 64 MiB VMEM) with an 8-aligned row block
    that evenly divides b*t, which also yields >=2 'parallel' steps for v7x megacore.
    """
    rows_total = bt * n
    if rows_total <= 2048:
        return bt
    target = max(1, 2048 // max(n, 1))
    best = None
    for c in range(1, bt + 1):
        if c <= target and bt % c == 0 and (c * n) % 8 == 0:
            best = c
    if best is None:
        return bt   # fallback: single full-array step (always legal)
    return best


def pack_params(params, *, heads):
    """One-time parameter packing (keep OUT of the per-call path):
       transpose, cast to bf16, fold 1/sqrt(d_k) into Wq/bq, split Wp per head."""
    d = params["wq"].shape[0]
    d_k = d // heads
    scale = 1.0 / math.sqrt(d_k)
    wqkv = jnp.stack([params["wq"].T * scale,
                      params["wk"].T,
                      params["wv"].T]).astype(jnp.bfloat16)               # (3, d, d)
    bqkv = jnp.stack([params["bq"] * scale,
                      params["bk"],
                      params["bv"]]).reshape(3, 1, d).astype(jnp.float32)  # (3, 1, d)
    wp = params["wp"].T.astype(jnp.bfloat16).reshape(heads, d_k, d)        # (h, d_k, d)
    bp = params["bp"].astype(jnp.float32).reshape(1, d)                    # (1, d)
    return {"wqkv": wqkv, "bqkv": bqkv, "wp": wp, "bp": bp}


@functools.partial(jax.jit, static_argnames=("heads",))
def spatial_attention(query, key, value, packed, *, heads, mask=None, adjm=None):
    """query/key/value: (b, t, n, d) float32. Returns (b, t, n, d) float32."""
    assert mask is None and adjm is None, "mask/adjm paths not implemented in-kernel"
    b, t, n, d = query.shape
    assert d % heads == 0
    d_k = d // heads
    bt = b * t
    m_total = bt * n

    slabs = _choose_slab_block(bt, n)
    row_blk = slabs * n
    grid = (bt // slabs,)

    # Fold (b, t, n) -> rows.  No dtype cast here (done in-kernel).
    xq = query.reshape(m_total, d)
    xk = key.reshape(m_total, d)
    xv = value.reshape(m_total, d)

    kernel = functools.partial(_attention_kernel,
                               heads=heads, d_k=d_k, n=n, slabs=slabs)

    flops = (3 * 2 * m_total * d * d            # qkv linears
             + 2 * m_total * d * d              # output projection (per-head sum)
             + bt * heads * 4 * n * n * d_k)    # scores + attn@v
    cost = pl.CostEstimate(
        flops=int(flops),
        transcendentals=int(bt * heads * n * n),
        bytes_accessed=int(4 * m_total * d * 4          # 3 inputs + 1 output, f32
                           + 4 * d * d * 2              # bf16 weights
                           + 4 * d * 4))                 # f32 biases

    out = pl.pallas_call(
        kernel,
        out_shape=jax.ShapeDtypeStruct((m_total, d), query.dtype),
        grid_spec=pltpu.PrefetchScalarGridSpec(
            num_scalar_prefetch=0,
            grid=grid,
            in_specs=[
                pl.BlockSpec((row_blk, d), lambda i: (i, 0)),         # xq
                pl.BlockSpec((row_blk, d), lambda i: (i, 0)),         # xk
                pl.BlockSpec((row_blk, d), lambda i: (i, 0)),         # xv
                pl.BlockSpec((3, d, d), lambda i: (0, 0, 0)),         # Wq/Wk/Wv (T, scaled)
                pl.BlockSpec((3, 1, d), lambda i: (0, 0, 0)),         # bq/bk/bv
                pl.BlockSpec((heads, d_k, d), lambda i: (0, 0, 0)),   # Wp split per head
                pl.BlockSpec((1, d), lambda i: (0, 0)),               # bp
            ],
            out_specs=pl.BlockSpec((row_blk, d), lambda i: (i, 0)),
        ),
        compiler_params=pltpu.CompilerParams(
            dimension_semantics=("parallel",)),
        cost_estimate=cost,
    )(xq, xk, xv, packed["wqkv"], packed["bqkv"], packed["wp"], packed["bp"])

    return out.reshape(b, t, n, d)


def _reference(query, key, value, params, *, heads):
    """Pure-JAX f32 reference mirroring the PyTorch forward (mask=None, adjm=None)."""
    b, t, n, d = query.shape
    d_k = d // heads

    def lin(x, w, bias):
        return jnp.einsum("btnd,ed->btne", x, w) + bias  # PyTorch Linear: x @ W^T + b

    q = lin(query, params["wq"], params["bq"]).reshape(b, t, n, heads, d_k)
    k = lin(key, params["wk"], params["bk"]).reshape(b, t, n, heads, d_k)
    v = lin(value, params["wv"], params["bv"]).reshape(b, t, n, heads, d_k)
    q, k, v = (jnp.transpose(x, (0, 3, 1, 2, 4)) for x in (q, k, v))   # b h t n d
    scores = jnp.einsum("bhtnd,bhtmd->bhtnm", q, k) / math.sqrt(d_k)
    attn = jax.nn.softmax(scores, axis=-1)
    x = jnp.einsum("bhtnm,bhtmd->bhtnd", attn, v)
    x = jnp.transpose(x, (0, 2, 3, 1, 4)).reshape(b, t, n, d)
    return jnp.einsum("btnd,ed->btne", x, params["wp"]) + params["bp"]


def _init_params(key, dim):
    ks = jax.random.split(key, 8)
    s = 0.02
    return {
        "wq": jax.random.normal(ks[0], (dim, dim), jnp.float32) * s,
        "bq": jax.random.normal(ks[1], (dim,), jnp.float32) * s,
        "wk": jax.random.normal(ks[2], (dim, dim), jnp.float32) * s,
        "bk": jax.random.normal(ks[3], (dim,), jnp.float32) * s,
        "wv": jax.random.normal(ks[4], (dim, dim), jnp.float32) * s,
        "bv": jax.random.normal(ks[5], (dim,), jnp.float32) * s,
        "wp": jax.random.normal(ks[6], (dim, dim), jnp.float32) * s,
        "bp": jax.random.normal(ks[7], (dim,), jnp.float32) * s,
    }


if __name__ == "__main__":
    b, t, n, dim, heads = 2, 3, 8, 32, 4
    root = jax.random.PRNGKey(0)
    kq, kk, kv, kp = jax.random.split(root, 4)

    query = jax.random.normal(kq, (b, t, n, dim), jnp.float32)
    key = jax.random.normal(kk, (b, t, n, dim), jnp.float32)
    value = jax.random.normal(kv, (b, t, n, dim), jnp.float32)
    params = _init_params(kp, dim)

    # One-time packing (not part of the per-call path).
    packed = jax.tree_util.tree_map(jax.block_until_ready,
                                    pack_params(params, heads=heads))

    out = spatial_attention(query, key, value, packed, heads=heads)
    out = jax.block_until_ready(out)

    ref = jax.block_until_ready(_reference(query, key, value, params, heads=heads))
    # bf16 matmul operands (f32 accumulation) + approx reciprocal -> looser tolerance.
    np.testing.assert_allclose(np.asarray(out), np.asarray(ref), atol=2e-3, rtol=2e-2)

    print("KERNEL_OK")
</pallas_src>

<mosaic_0001>
module attributes {stable_mosaic.version = 11 : i64} {
  func.func @_attention_kernel(%arg0: i32, %arg1: memref<48x32xf32, #tpu.memory_space<vmem>>, %arg2: memref<48x32xf32, #tpu.memory_space<vmem>>, %arg3: memref<48x32xf32, #tpu.memory_space<vmem>>, %arg4: memref<3x32x32xbf16, #tpu.memory_space<vmem>>, %arg5: memref<3x1x32xf32, #tpu.memory_space<vmem>>, %arg6: memref<4x8x32xbf16, #tpu.memory_space<vmem>>, %arg7: memref<1x32xf32, #tpu.memory_space<vmem>>, %arg8: memref<48x32xf32, #tpu.memory_space<vmem>>) attributes {dimension_semantics = [#tpu.dimension_semantics<parallel>], iteration_bounds = array<i64: 1>, scalar_prefetch = 0 : i64, scratch_operands = 0 : i64, tpu.core_type = #tpu.core_type<tc>, window_params = [{transform_indices = @transform_0, window_bounds = array<i64: 48, 32>}, {transform_indices = @transform_1, window_bounds = array<i64: 48, 32>}, {transform_indices = @transform_2, window_bounds = array<i64: 48, 32>}, {pipeline_mode = #tpu.pipeline_mode<synchronous>, transform_indices = @transform_3, window_bounds = array<i64: 3, 32, 32>}, {pipeline_mode = #tpu.pipeline_mode<synchronous>, transform_indices = @transform_4, window_bounds = array<i64: 3, 1, 32>}, {pipeline_mode = #tpu.pipeline_mode<synchronous>, transform_indices = @transform_5, window_bounds = array<i64: 4, 8, 32>}, {pipeline_mode = #tpu.pipeline_mode<synchronous>, transform_indices = @transform_6, window_bounds = array<i64: 1, 32>}, {transform_indices = @transform_7, window_bounds = array<i64: 48, 32>}]} {
    %c0 = arith.constant 0 : index
    %c0_0 = arith.constant 0 : index
    %0 = vector.load %arg1[%c0, %c0_0] : memref<48x32xf32, #tpu.memory_space<vmem>>, vector<48x32xf32>
    %1 = arith.truncf %0 : vector<48x32xf32> to vector<48x32xbf16>
    %c0_1 = arith.constant 0 : index
    %c0_2 = arith.constant 0 : index
    %2 = vector.load %arg2[%c0_1, %c0_2] : memref<48x32xf32, #tpu.memory_space<vmem>>, vector<48x32xf32>
    %3 = arith.truncf %2 : vector<48x32xf32> to vector<48x32xbf16>
    %c0_3 = arith.constant 0 : index
    %c0_4 = arith.constant 0 : index
    %4 = vector.load %arg3[%c0_3, %c0_4] : memref<48x32xf32, #tpu.memory_space<vmem>>, vector<48x32xf32>
    %5 = arith.truncf %4 : vector<48x32xf32> to vector<48x32xbf16>
    %c0_5 = arith.constant 0 : index
    %c0_6 = arith.constant 0 : index
    %c0_7 = arith.constant 0 : index
    %6 = vector.load %arg4[%c0_5, %c0_6, %c0_7] : memref<3x32x32xbf16, #tpu.memory_space<vmem>>, vector<1x32x32xbf16>
    %7 = vector.shape_cast %6 : vector<1x32x32xbf16> to vector<32x32xbf16>
    %cst = arith.constant dense<0.000000e+00> : vector<48x32xf32>
    %8 = tpu.matmul %1, %7, %cst {dimension_numbers = #tpu.dot_dimension_numbers<[1], [0], [0], [1], [0, 0, 1, 1], [], []>} : vector<48x32xbf16>, vector<32x32xbf16>, vector<48x32xf32> -> vector<48x32xf32>
    %c0_8 = arith.constant 0 : index
    %c0_9 = arith.constant 0 : index
    %c0_10 = arith.constant 0 : index
    %9 = vector.load %arg5[%c0_8, %c0_9, %c0_10] : memref<3x1x32xf32, #tpu.memory_space<vmem>>, vector<1x1x32xf32>
    %10 = vector.shape_cast %9 : vector<1x1x32xf32> to vector<1x32xf32>
    %11 = vector.broadcast %10 : vector<1x32xf32> to vector<48x32xf32>
    %12 = arith.addf %8, %11 : vector<48x32xf32>
    %c1 = arith.constant 1 : index
    %c0_11 = arith.constant 0 : index
    %c0_12 = arith.constant 0 : index
    %13 = vector.load %arg4[%c1, %c0_11, %c0_12] : memref<3x32x32xbf16, #tpu.memory_space<vmem>>, vector<1x32x32xbf16>
    %14 = vector.shape_cast %13 : vector<1x32x32xbf16> to vector<32x32xbf16>
    %cst_13 = arith.constant dense<0.000000e+00> : vector<48x32xf32>
    %15 = tpu.matmul %3, %14, %cst_13 {dimension_numbers = #tpu.dot_dimension_numbers<[1], [0], [0], [1], [0, 0, 1, 1], [], []>} : vector<48x32xbf16>, vector<32x32xbf16>, vector<48x32xf32> -> vector<48x32xf32>
    %c1_14 = arith.constant 1 : index
    %c0_15 = arith.constant 0 : index
    %c0_16 = arith.constant 0 : index
    %16 = vector.load %arg5[%c1_14, %c0_15, %c0_16] : memref<3x1x32xf32, #tpu.memory_space<vmem>>, vector<1x1x32xf32>
    %17 = vector.shape_cast %16 : vector<1x1x32xf32> to vector<1x32xf32>
    %18 = vector.broadcast %17 : vector<1x32xf32> to vector<48x32xf32>
    %19 = arith.addf %15, %18 : vector<48x32xf32>
    %c2 = arith.constant 2 : index
    %c0_17 = arith.constant 0 : index
    %c0_18 = arith.constant 0 : index
    %20 = vector.load %arg4[%c2, %c0_17, %c0_18] : memref<3x32x32xbf16, #tpu.memory_space<vmem>>, vector<1x32x32xbf16>
    %21 = vector.shape_cast %20 : vector<1x32x32xbf16> to vector<32x32xbf16>
    %cst_19 = arith.constant dense<0.000000e+00> : vector<48x32xf32>
    %22 = tpu.matmul %5, %21, %cst_19 {dimension_numbers = #tpu.dot_dimension_numbers<[1], [0], [0], [1], [0, 0, 1, 1], [], []>} : vector<48x32xbf16>, vector<32x32xbf16>, vector<48x32xf32> -> vector<48x32xf32>
    %c2_20 = arith.constant 2 : index
    %c0_21 = arith.constant 0 : index
    %c0_22 = arith.constant 0 : index
    %23 = vector.load %arg5[%c2_20, %c0_21, %c0_22] : memref<3x1x32xf32, #tpu.memory_space<vmem>>, vector<1x1x32xf32>
    %24 = vector.shape_cast %23 : vector<1x1x32xf32> to vector<1x32xf32>
    %25 = vector.broadcast %24 : vector<1x32xf32> to vector<48x32xf32>
    %26 = arith.addf %22, %25 : vector<48x32xf32>
    %cst_23 = arith.constant 0.000000e+00 : f32
    %27 = vector.broadcast %cst_23 : f32 to vector<48x32xf32>
    %28 = vector.extract_strided_slice %12 {offsets = [0, 0], sizes = [48, 8], strides = [1, 1]} : vector<48x32xf32> to vector<48x8xf32>
    %29 = arith.truncf %28 : vector<48x8xf32> to vector<48x8xbf16>
    %30 = vector.shape_cast %29 : vector<48x8xbf16> to vector<6x8x8xbf16>
    %31 = vector.extract_strided_slice %19 {offsets = [0, 0], sizes = [48, 8], strides = [1, 1]} : vector<48x32xf32> to vector<48x8xf32>
    %32 = arith.truncf %31 : vector<48x8xf32> to vector<48x8xbf16>
    %33 = vector.shape_cast %32 : vector<48x8xbf16> to vector<6x8x8xbf16>
    %34 = vector.extract_strided_slice %26 {offsets = [0, 0], sizes = [48, 8], strides = [1, 1]} : vector<48x32xf32> to vector<48x8xf32>
    %35 = arith.truncf %34 : vector<48x8xf32> to vector<48x8xbf16>
    %36 = vector.shape_cast %35 : vector<48x8xbf16> to vector<6x8x8xbf16>
    "tpu.trace_start"() <{level = 10 : i32, message = "bnd,bmd->bnm"}> : () -> ()
    %cst_24 = arith.constant dense<0.000000e+00> : vector<6x8x8xf32>
    %37 = tpu.matmul %30, %33, %cst_24 {dimension_numbers = #tpu.dot_dimension_numbers<[2], [2], [1], [1], [0, 0, 0, 1, 1, 1], [0], [0]>} : vector<6x8x8xbf16>, vector<6x8x8xbf16>, vector<6x8x8xf32> -> vector<6x8x8xf32>
    "tpu.trace_stop"() : () -> ()
    %cst_25 = arith.constant dense<0xFF800000> : vector<6x8xf32>
    %38 = vector.multi_reduction <maximumf>, %37, %cst_25 [2] : vector<6x8x8xf32> to vector<6x8xf32>
    %39 = vector.shape_cast %38 : vector<6x8xf32> to vector<6x8x1xf32>
    %40 = vector.broadcast %39 : vector<6x8x1xf32> to vector<6x8x8xf32>
    %41 = arith.subf %37, %40 : vector<6x8x8xf32>
    %42 = math.exp %41 : vector<6x8x8xf32>
    %cst_26 = arith.constant dense<0.000000e+00> : vector<6x8xf32>
    %43 = vector.multi_reduction <add>, %42, %cst_26 [2] : vector<6x8x8xf32> to vector<6x8xf32>
    %44 = vector.shape_cast %43 : vector<6x8xf32> to vector<6x8x1xf32>
    %45 = tpu.reciprocal %44 {approx = true} : vector<6x8x1xf32> -> vector<6x8x1xf32>
    %46 = vector.broadcast %45 : vector<6x8x1xf32> to vector<6x8x8xf32>
    %47 = arith.mulf %42, %46 : vector<6x8x8xf32>
    %48 = arith.truncf %47 : vector<6x8x8xf32> to vector<6x8x8xbf16>
    "tpu.trace_start"() <{level = 10 : i32, message = "bnm,bmd->bnd"}> : () -> ()
    %cst_27 = arith.constant dense<0.000000e+00> : vector<6x8x8xf32>
    %49 = tpu.matmul %48, %36, %cst_27 {dimension_numbers = #tpu.dot_dimension_numbers<[2], [1], [1], [2], [0, 0, 0, 1, 1, 2], [0], [0]>} : vector<6x8x8xbf16>, vector<6x8x8xbf16>, vector<6x8x8xf32> -> vector<6x8x8xf32>
    "tpu.trace_stop"() : () -> ()
    %50 = vector.shape_cast %49 : vector<6x8x8xf32> to vector<48x8xf32>
    %51 = arith.truncf %50 : vector<48x8xf32> to vector<48x8xbf16>
    %c0_28 = arith.constant 0 : index
    %c0_29 = arith.constant 0 : index
    %c0_30 = arith.constant 0 : index
    %52 = vector.load %arg6[%c0_28, %c0_29, %c0_30] : memref<4x8x32xbf16, #tpu.memory_space<vmem>>, vector<1x8x32xbf16>
    %53 = vector.shape_cast %52 : vector<1x8x32xbf16> to vector<8x32xbf16>
    %cst_31 = arith.constant dense<0.000000e+00> : vector<48x32xf32>
    %54 = tpu.matmul %51, %53, %cst_31 {dimension_numbers = #tpu.dot_dimension_numbers<[1], [0], [0], [1], [0, 0, 1, 1], [], []>} : vector<48x8xbf16>, vector<8x32xbf16>, vector<48x32xf32> -> vector<48x32xf32>
    %55 = arith.addf %27, %54 : vector<48x32xf32>
    %56 = vector.extract_strided_slice %12 {offsets = [0, 8], sizes = [48, 8], strides = [1, 1]} : vector<48x32xf32> to vector<48x8xf32>
    %57 = arith.truncf %56 : vector<48x8xf32> to vector<48x8xbf16>
    %58 = vector.shape_cast %57 : vector<48x8xbf16> to vector<6x8x8xbf16>
    %59 = vector.extract_strided_slice %19 {offsets = [0, 8], sizes = [48, 8], strides = [1, 1]} : vector<48x32xf32> to vector<48x8xf32>
    %60 = arith.truncf %59 : vector<48x8xf32> to vector<48x8xbf16>
    %61 = vector.shape_cast %60 : vector<48x8xbf16> to vector<6x8x8xbf16>
    %62 = vector.extract_strided_slice %26 {offsets = [0, 8], sizes = [48, 8], strides = [1, 1]} : vector<48x32xf32> to vector<48x8xf32>
    %63 = arith.truncf %62 : vector<48x8xf32> to vector<48x8xbf16>
    %64 = vector.shape_cast %63 : vector<48x8xbf16> to vector<6x8x8xbf16>
    "tpu.trace_start"() <{level = 10 : i32, message = "bnd,bmd->bnm"}> : () -> ()
    %cst_32 = arith.constant dense<0.000000e+00> : vector<6x8x8xf32>
    %65 = tpu.matmul %58, %61, %cst_32 {dimension_numbers = #tpu.dot_dimension_numbers<[2], [2], [1], [1], [0, 0, 0, 1, 1, 1], [0], [0]>} : vector<6x8x8xbf16>, vector<6x8x8xbf16>, vector<6x8x8xf32> -> vector<6x8x8xf32>
    "tpu.trace_stop"() : () -> ()
    %cst_33 = arith.constant dense<0xFF800000> : vector<6x8xf32>
    %66 = vector.multi_reduction <maximumf>, %65, %cst_33 [2] : vector<6x8x8xf32> to vector<6x8xf32>
    %67 = vector.shape_cast %66 : vector<6x8xf32> to vector<6x8x1xf32>
    %68 = vector.broadcast %67 : vector<6x8x1xf32> to vector<6x8x8xf32>
    %69 = arith.subf %65, %68 : vector<6x8x8xf32>
    %70 = math.exp %69 : vector<6x8x8xf32>
    %cst_34 = arith.constant dense<0.000000e+00> : vector<6x8xf32>
    %71 = vector.multi_reduction <add>, %70, %cst_34 [2] : vector<6x8x8xf32> to vector<6x8xf32>
    %72 = vector.shape_cast %71 : vector<6x8xf32> to vector<6x8x1xf32>
    %73 = tpu.reciprocal %72 {approx = true} : vector<6x8x1xf32> -> vector<6x8x1xf32>
    %74 = vector.broadcast %73 : vector<6x8x1xf32> to vector<6x8x8xf32>
    %75 = arith.mulf %70, %74 : vector<6x8x8xf32>
    %76 = arith.truncf %75 : vector<6x8x8xf32> to vector<6x8x8xbf16>
    "tpu.trace_start"() <{level = 10 : i32, message = "bnm,bmd->bnd"}> : () -> ()
    %cst_35 = arith.constant dense<0.000000e+00> : vector<6x8x8xf32>
    %77 = tpu.matmul %76, %64, %cst_35 {dimension_numbers = #tpu.dot_dimension_numbers<[2], [1], [1], [2], [0, 0, 0, 1, 1, 2], [0], [0]>} : vector<6x8x8xbf16>, vector<6x8x8xbf16>, vector<6x8x8xf32> -> vector<6x8x8xf32>
    "tpu.trace_stop"() : () -> ()
    %78 = vector.shape_cast %77 : vector<6x8x8xf32> to vector<48x8xf32>
    %79 = arith.truncf %78 : vector<48x8xf32> to vector<48x8xbf16>
    %c1_36 = arith.constant 1 : index
    %c0_37 = arith.constant 0 : index
    %c0_38 = arith.constant 0 : index
    %80 = vector.load %arg6[%c1_36, %c0_37, %c0_38] : memref<4x8x32xbf16, #tpu.memory_space<vmem>>, vector<1x8x32xbf16>
    %81 = vector.shape_cast %80 : vector<1x8x32xbf16> to vector<8x32xbf16>
    %cst_39 = arith.constant dense<0.000000e+00> : vector<48x32xf32>
    %82 = tpu.matmul %79, %81, %cst_39 {dimension_numbers = #tpu.dot_dimension_numbers<[1], [0], [0], [1], [0, 0, 1, 1], [], []>} : vector<48x8xbf16>, vector<8x32xbf16>, vector<48x32xf32> -> vector<48x32xf32>
    %83 = arith.addf %55, %82 : vector<48x32xf32>
    %84 = vector.extract_strided_slice %12 {offsets = [0, 16], sizes = [48, 8], strides = [1, 1]} : vector<48x32xf32> to vector<48x8xf32>
    %85 = arith.truncf %84 : vector<48x8xf32> to vector<48x8xbf16>
    %86 = vector.shape_cast %85 : vector<48x8xbf16> to vector<6x8x8xbf16>
    %87 = vector.extract_strided_slice %19 {offsets = [0, 16], sizes = [48, 8], strides = [1, 1]} : vector<48x32xf32> to vector<48x8xf32>
    %88 = arith.truncf %87 : vector<48x8xf32> to vector<48x8xbf16>
    %89 = vector.shape_cast %88 : vector<48x8xbf16> to vector<6x8x8xbf16>
    %90 = vector.extract_strided_slice %26 {offsets = [0, 16], sizes = [48, 8], strides = [1, 1]} : vector<48x32xf32> to vector<48x8xf32>
    %91 = arith.truncf %90 : vector<48x8xf32> to vector<48x8xbf16>
    %92 = vector.shape_cast %91 : vector<48x8xbf16> to vector<6x8x8xbf16>
    "tpu.trace_start"() <{level = 10 : i32, message = "bnd,bmd->bnm"}> : () -> ()
    %cst_40 = arith.constant dense<0.000000e+00> : vector<6x8x8xf32>
    %93 = tpu.matmul %86, %89, %cst_40 {dimension_numbers = #tpu.dot_dimension_numbers<[2], [2], [1], [1], [0, 0, 0, 1, 1, 1], [0], [0]>} : vector<6x8x8xbf16>, vector<6x8x8xbf16>, vector<6x8x8xf32> -> vector<6x8x8xf32>
    "tpu.trace_stop"() : () -> ()
    %cst_41 = arith.constant dense<0xFF800000> : vector<6x8xf32>
    %94 = vector.multi_reduction <maximumf>, %93, %cst_41 [2] : vector<6x8x8xf32> to vector<6x8xf32>
    %95 = vector.shape_cast %94 : vector<6x8xf32> to vector<6x8x1xf32>
    %96 = vector.broadcast %95 : vector<6x8x1xf32> to vector<6x8x8xf32>
    %97 = arith.subf %93, %96 : vector<6x8x8xf32>
    %98 = math.exp %97 : vector<6x8x8xf32>
    %cst_42 = arith.constant dense<0.000000e+00> : vector<6x8xf32>
    %99 = vector.multi_reduction <add>, %98, %cst_42 [2] : vector<6x8x8xf32> to vector<6x8xf32>
    %100 = vector.shape_cast %99 : vector<6x8xf32> to vector<6x8x1xf32>
    %101 = tpu.reciprocal %100 {approx = true} : vector<6x8x1xf32> -> vector<6x8x1xf32>
    %102 = vector.broadcast %101 : vector<6x8x1xf32> to vector<6x8x8xf32>
    %103 = arith.mulf %98, %102 : vector<6x8x8xf32>
    %104 = arith.truncf %103 : vector<6x8x8xf32> to vector<6x8x8xbf16>
    "tpu.trace_start"() <{level = 10 : i32, message = "bnm,bmd->bnd"}> : () -> ()
    %cst_43 = arith.constant dense<0.000000e+00> : vector<6x8x8xf32>
    %105 = tpu.matmul %104, %92, %cst_43 {dimension_numbers = #tpu.dot_dimension_numbers<[2], [1], [1], [2], [0, 0, 0, 1, 1, 2], [0], [0]>} : vector<6x8x8xbf16>, vector<6x8x8xbf16>, vector<6x8x8xf32> -> vector<6x8x8xf32>
    "tpu.trace_stop"() : () -> ()
    %106 = vector.shape_cast %105 : vector<6x8x8xf32> to vector<48x8xf32>
    %107 = arith.truncf %106 : vector<48x8xf32> to vector<48x8xbf16>
    %c2_44 = arith.constant 2 : index
    %c0_45 = arith.constant 0 : index
    %c0_46 = arith.constant 0 : index
    %108 = vector.load %arg6[%c2_44, %c0_45, %c0_46] : memref<4x8x32xbf16, #tpu.memory_space<vmem>>, vector<1x8x32xbf16>
    %109 = vector.shape_cast %108 : vector<1x8x32xbf16> to vector<8x32xbf16>
    %cst_47 = arith.constant dense<0.000000e+00> : vector<48x32xf32>
    %110 = tpu.matmul %107, %109, %cst_47 {dimension_numbers = #tpu.dot_dimension_numbers<[1], [0], [0], [1], [0, 0, 1, 1], [], []>} : vector<48x8xbf16>, vector<8x32xbf16>, vector<48x32xf32> -> vector<48x32xf32>
    %111 = arith.addf %83, %110 : vector<48x32xf32>
    %112 = vector.extract_strided_slice %12 {offsets = [0, 24], sizes = [48, 8], strides = [1, 1]} : vector<48x32xf32> to vector<48x8xf32>
    %113 = arith.truncf %112 : vector<48x8xf32> to vector<48x8xbf16>
    %114 = vector.shape_cast %113 : vector<48x8xbf16> to vector<6x8x8xbf16>
    %115 = vector.extract_strided_slice %19 {offsets = [0, 24], sizes = [48, 8], strides = [1, 1]} : vector<48x32xf32> to vector<48x8xf32>
    %116 = arith.truncf %115 : vector<48x8xf32> to vector<48x8xbf16>
    %117 = vector.shape_cast %116 : vector<48x8xbf16> to vector<6x8x8xbf16>
    %118 = vector.extract_strided_slice %26 {offsets = [0, 24], sizes = [48, 8], strides = [1, 1]} : vector<48x32xf32> to vector<48x8xf32>
    %119 = arith.truncf %118 : vector<48x8xf32> to vector<48x8xbf16>
    %120 = vector.shape_cast %119 : vector<48x8xbf16> to vector<6x8x8xbf16>
    "tpu.trace_start"() <{level = 10 : i32, message = "bnd,bmd->bnm"}> : () -> ()
    %cst_48 = arith.constant dense<0.000000e+00> : vector<6x8x8xf32>
    %121 = tpu.matmul %114, %117, %cst_48 {dimension_numbers = #tpu.dot_dimension_numbers<[2], [2], [1], [1], [0, 0, 0, 1, 1, 1], [0], [0]>} : vector<6x8x8xbf16>, vector<6x8x8xbf16>, vector<6x8x8xf32> -> vector<6x8x8xf32>
    "tpu.trace_stop"() : () -> ()
    %cst_49 = arith.constant dense<0xFF800000> : vector<6x8xf32>
    %122 = vector.multi_reduction <maximumf>, %121, %cst_49 [2] : vector<6x8x8xf32> to vector<6x8xf32>
    %123 = vector.shape_cast %122 : vector<6x8xf32> to vector<6x8x1xf32>
    %124 = vector.broadcast %123 : vector<6x8x1xf32> to vector<6x8x8xf32>
    %125 = arith.subf %121, %124 : vector<6x8x8xf32>
    %126 = math.exp %125 : vector<6x8x8xf32>
    %cst_50 = arith.constant dense<0.000000e+00> : vector<6x8xf32>
    %127 = vector.multi_reduction <add>, %126, %cst_50 [2] : vector<6x8x8xf32> to vector<6x8xf32>
    %128 = vector.shape_cast %127 : vector<6x8xf32> to vector<6x8x1xf32>
    %129 = tpu.reciprocal %128 {approx = true} : vector<6x8x1xf32> -> vector<6x8x1xf32>
    %130 = vector.broadcast %129 : vector<6x8x1xf32> to vector<6x8x8xf32>
    %131 = arith.mulf %126, %130 : vector<6x8x8xf32>
    %132 = arith.truncf %131 : vector<6x8x8xf32> to vector<6x8x8xbf16>
    "tpu.trace_start"() <{level = 10 : i32, message = "bnm,bmd->bnd"}> : () -> ()
    %cst_51 = arith.constant dense<0.000000e+00> : vector<6x8x8xf32>
    %133 = tpu.matmul %132, %120, %cst_51 {dimension_numbers = #tpu.dot_dimension_numbers<[2], [1], [1], [2], [0, 0, 0, 1, 1, 2], [0], [0]>} : vector<6x8x8xbf16>, vector<6x8x8xbf16>, vector<6x8x8xf32> -> vector<6x8x8xf32>
    "tpu.trace_stop"() : () -> ()
    %134 = vector.shape_cast %133 : vector<6x8x8xf32> to vector<48x8xf32>
    %135 = arith.truncf %134 : vector<48x8xf32> to vector<48x8xbf16>
    %c3 = arith.constant 3 : index
    %c0_52 = arith.constant 0 : index
    %c0_53 = arith.constant 0 : index
    %136 = vector.load %arg6[%c3, %c0_52, %c0_53] : memref<4x8x32xbf16, #tpu.memory_space<vmem>>, vector<1x8x32xbf16>
    %137 = vector.shape_cast %136 : vector<1x8x32xbf16> to vector<8x32xbf16>
    %cst_54 = arith.constant dense<0.000000e+00> : vector<48x32xf32>
    %138 = tpu.matmul %135, %137, %cst_54 {dimension_numbers = #tpu.dot_dimension_numbers<[1], [0], [0], [1], [0, 0, 1, 1], [], []>} : vector<48x8xbf16>, vector<8x32xbf16>, vector<48x32xf32> -> vector<48x32xf32>
    %139 = arith.addf %111, %138 : vector<48x32xf32>
    %c0_55 = arith.constant 0 : index
    %c0_56 = arith.constant 0 : index
    %140 = vector.load %arg7[%c0_55, %c0_56] : memref<1x32xf32, #tpu.memory_space<vmem>>, vector<1x32xf32>
    %141 = vector.broadcast %140 : vector<1x32xf32> to vector<48x32xf32>
    %142 = arith.addf %139, %141 : vector<48x32xf32>
    %c0_57 = arith.constant 0 : index
    %c0_58 = arith.constant 0 : index
    %143 = vector.load %arg8[%c0_57, %c0_58] : memref<48x32xf32, #tpu.memory_space<vmem>>, vector<48x32xf32>
    tpu.vector_store %arg8[%c0_57, %c0_58], %142 {strides = array<i32>} : memref<48x32xf32, #tpu.memory_space<vmem>>, vector<48x32xf32>,
    return
  }
  func.func @transform_0(%arg0: i32) -> (i32, i32) {
    %c0_i32 = arith.constant 0 : i32
    %c0_i32_0 = arith.constant 0 : i32
    return %arg0, %c0_i32 : i32, i32
  }
  func.func @transform_1(%arg0: i32) -> (i32, i32) {
    %c0_i32 = arith.constant 0 : i32
    %c0_i32_0 = arith.constant 0 : i32
    return %arg0, %c0_i32 : i32, i32
  }
  func.func @transform_2(%arg0: i32) -> (i32, i32) {
    %c0_i32 = arith.constant 0 : i32
    %c0_i32_0 = arith.constant 0 : i32
    return %arg0, %c0_i32 : i32, i32
  }
  func.func @transform_3(%arg0: i32) -> (i32, i32, i32) {
    %c0_i32 = arith.constant 0 : i32
    %c0_i32_0 = arith.constant 0 : i32
    %c0_i32_1 = arith.constant 0 : i32
    %c0_i32_2 = arith.constant 0 : i32
    return %c0_i32, %c0_i32_0, %c0_i32_1 : i32, i32, i32
  }
  func.func @transform_4(%arg0: i32) -> (i32, i32, i32) {
    %c0_i32 = arith.constant 0 : i32
    %c0_i32_0 = arith.constant 0 : i32
    %c0_i32_1 = arith.constant 0 : i32
    %c0_i32_2 = arith.constant 0 : i32
    return %c0_i32, %c0_i32_0, %c0_i32_1 : i32, i32, i32
  }
  func.func @transform_5(%arg0: i32) -> (i32, i32, i32) {
    %c0_i32 = arith.constant 0 : i32
    %c0_i32_0 = arith.constant 0 : i32
    %c0_i32_1 = arith.constant 0 : i32
    %c0_i32_2 = arith.constant 0 : i32
    return %c0_i32, %c0_i32_0, %c0_i32_1 : i32, i32, i32
  }
  func.func @transform_6(%arg0: i32) -> (i32, i32) {
    %c0_i32 = arith.constant 0 : i32
    %c0_i32_0 = arith.constant 0 : i32
    %c0_i32_1 = arith.constant 0 : i32
    return %c0_i32, %c0_i32_0 : i32, i32
  }
  func.func @transform_7(%arg0: i32) -> (i32, i32) {
    %c0_i32 = arith.constant 0 : i32
    %c0_i32_0 = arith.constant 0 : i32
    return %arg0, %c0_i32 : i32, i32
  }
}

</mosaic_0001>

<bundles_post_ra>
// kernel: spatial_attention.1
= control target key start
LH: loop header
LB: loop body
LE: loop exit
PB: predicated region body
PF: predicated region fallthrough
CT: control target
= control target key end

     0   :  { %12 = vsyncpa [#allocation3], 0  ;;  %s5091_s0 = inlined_call_operand.hbm [shape: f32[48,32], index: 0, kind: input, shape index: {}]   ;;  %s5092_s1 = inlined_call_operand.hbm [shape: f32[48,32], index: 1, kind: input, shape index: {}]   ;;  %s5093_s2 = inlined_call_operand.hbm [shape: f32[48,32], index: 2, kind: input, shape index: {}]   ;;  %s5094_s3 = inlined_call_operand.hbm [shape: bf16[3,32,32], index: 3, kind: input, shape index: {}]   ;;  %s5095_s4 = inlined_call_operand.vmem [shape: f32[3,1,32], index: 4, kind: input, shape index: {}]   ;;  %s5096_s5 = inlined_call_operand.hbm [shape: bf16[4,8,32], index: 5, kind: input, shape index: {}]   ;;  %s5097_s6 = inlined_call_operand.vmem [shape: f32[1,32], index: 6, kind: input, shape index: {}]   ;;  %s5098_s7 = inlined_call_operand.hbm [shape: f32[48,32], index: 7, kind: output, shape index: {}]  }
   0x1   :  { %13 = vsyncpa [#allocation6], 0 }
   0x2   :  { %14 = vsyncpa [#allocation9], 0 }
   0x3   :  { %15 = vsyncpa [#allocation4], 0  ;;  %s4285_s24 = smov [#allocation5]   ;;  %s4286_s26 = smov [#allocation8]  }
   0x4   :  { %s33_s25 = sshll.u32 %s4285_s24, 4  ;;  %s57_s27 = sshll.u32 %s4286_s26, 4  ;;  %s34_s25 = int_to_ptr.vmem [resolvable:$true] %s33_s25  ;;  %s58_s27 = int_to_ptr.vmem [resolvable:$true] %s57_s27 }
   0x5   :  { %s4165_s28 = scalar_lea.vmem %s34_s25, 768  ;;  %p4170_p1 = scmp.lt.s32.totalorder %s34_s25, %s34_s25 }
   0x6   :  { %p4166_p0 = scmp.ne.s32.totalorder %s34_s25, %s4165_s28  ;;  %p4171_p2 = scmp.lt.s32.totalorder %s4165_s28, %s4165_s28 }
   0x8   :  { %p4172_p3 = por %p4171_p2, %p4170_p1 }
   0xa   :  { %p4173_p4 = pnand %p4172_p3, %p4166_p0 }
   0xc   :  { %4176 = shalt.err (!%p4173_p4)
}
   0xd   :  { %s4287_s29 = smov 128   ;;  %s4288_s30 = smov 8  }
   0xe   :  { %39 = dma.hbm_to_vmem [thread:$0]  %s5092_s1, 768, %s34_s25, [#allocation6], %s4287_s29, %s4287_s29, %s4288_s30  }
   0xf   :  { %s4185_s10 = scalar_lea.vmem %s58_s27, 768  ;;  %p4190_p6 = scmp.lt.s32.totalorder %s58_s27, %s58_s27 }
  0x10   :  { %p4186_p5 = scmp.ne.s32.totalorder %s58_s27, %s4185_s10  ;;  %p4191_p7 = scmp.lt.s32.totalorder %s4185_s10, %s4185_s10 }
  0x12   :  { %p4192_p8 = por %p4191_p7, %p4190_p6 }
  0x14   :  { %p4193_p9 = pnand %p4192_p8, %p4186_p5 }
  0x16   :  { %4196 = shalt.err (!%p4193_p9)
}
  0x17   :  { %s4289_s11 = smov 64   ;;  %s4290_s12 = smov 4  }
  0x18   :  { %63 = dma.hbm_to_vmem [thread:$0]  %s5094_s3, 768, %s58_s27, [#allocation9], %s4289_s11, %s4289_s11, %s4290_s12  }
  0x19   :  { %s4291_s15 = smov [#allocation2]   ;;  %s4292_s17 = smov [#allocation7]  }
  0x1a   :  { %s21_s16 = sshll.u32 %s4291_s15, 4  ;;  %s45_s1 = sshll.u32 %s4292_s17, 4  ;;  %s22_s16 = int_to_ptr.vmem [resolvable:$true] %s21_s16  ;;  %s46_s1 = int_to_ptr.vmem [resolvable:$true] %s45_s1 }
  0x1b   :  { %s4205_s18 = scalar_lea.vmem %s22_s16, 768  ;;  %p4210_p11 = scmp.lt.s32.totalorder %s22_s16, %s22_s16 }
  0x1c   :  { %p4206_p10 = scmp.ne.s32.totalorder %s22_s16, %s4205_s18  ;;  %p4211_p12 = scmp.lt.s32.totalorder %s4205_s18, %s4205_s18 }
  0x1e   :  { %p4212_p13 = por %p4211_p12, %p4210_p11 }
  0x20   :  { %p4213_p0 = pnand %p4212_p13, %p4206_p10 }
  0x22   :  { %4216 = shalt.err (!%p4213_p0)
}
  0x23   :  { %27 = dma.hbm_to_vmem [thread:$0]  %s5091_s0, 768, %s22_s16, [#allocation3], %s4287_s29, %s4287_s29, %s4288_s30  }
  0x24   :  { %s4225_s3 = scalar_lea.vmem %s46_s1, 768  ;;  %p4230_p2 = scmp.lt.s32.totalorder %s46_s1, %s46_s1 }
  0x25   :  { %p4226_p1 = scmp.ne.s32.totalorder %s46_s1, %s4225_s3  ;;  %p4231_p3 = scmp.lt.s32.totalorder %s4225_s3, %s4225_s3 }
  0x27   :  { %p4232_p4 = por %p4231_p3, %p4230_p2 }
  0x29   :  { %p4233_p5 = pnand %p4232_p4, %p4226_p1 }
  0x2b   :  { %4236 = shalt.err (!%p4233_p5)
}
  0x2c   :  { %51 = dma.hbm_to_vmem [thread:$0]  %s5093_s2, 768, %s46_s1, [#allocation6], %s4287_s29, %s4287_s29, %s4288_s30  }
  0x2d   :  { %s4293_s23 = smov [#allocation10]  }
  0x2e   :  { %s71_s24 = sshll.u32 %s4293_s23, 4  ;;  %s72_s24 = int_to_ptr.vmem [resolvable:$true] %s71_s24 }
  0x2f   :  { %s4245_s25 = scalar_lea.vmem %s72_s24, 256  ;;  %p4250_p7 = scmp.lt.s32.totalorder %s72_s24, %s72_s24 }
  0x30   :  { %p4246_p6 = scmp.ne.s32.totalorder %s72_s24, %s4245_s25  ;;  %p4251_p8 = scmp.lt.s32.totalorder %s4245_s25, %s4245_s25 }
  0x32   :  { %p4252_p9 = por %p4251_p8, %p4250_p7 }
  0x34   :  { %p4253_p10 = pnand %p4252_p9, %p4246_p6 }
  0x36   :  { %4256 = shalt.err (!%p4253_p10)
}
  0x37   :  { %77 = dma.hbm_to_vmem [thread:$0]  %s5096_s5, 256, %s72_s24, [#allocation9], %s4289_s11, %s4289_s11, %s4290_s12  }
  0x38   :  { %4277 = dma.done.wait [#allocation3], 768  }
  0x39   :  { %4278 = vsyncadd [#allocation3], 4294966528 }
  0x3a   :  { %4279 = dma.done.wait [#allocation6], 1536  }
  0x3b   :  { %4280 = vsyncadd [#allocation6], 4294965760 }
  0x3c   :  { %4281 = dma.done.wait [#allocation9], 1024  }
  0x3d   :  { %4282 = vsyncadd [#allocation9], 4294966272  ;;  %v4294_v0 = vmov 0.0   ;;  %vm4295_vm0 = vmmov 0   ;;  %v4055_v1 = vld [vmem:[#allocation8 + $0x8] sm:$0xff]   ;;  %v4056_v2 = vld [vmem:[#allocation8] sm:$0xff]  }
  0x3e   :  { %4036 = vmatprep.subr.bf16.mxu1 %v4294_v0  ;;  %3652 = vmatprep.mubr.msk.bf16.mxu1 %vm4295_vm0, %v4294_v0  ;;  %v98_v3 = vld [vmem:[#allocation2 + $0x10] sm:$0xff]  ;;  %v99_v4 = vld [vmem:[#allocation2 + $0x18] sm:$0xff]  ;;  %vm146_vm1 = vcmask 261120   ;;  %v4057_v6 = vld [vmem:[#allocation8 + $0x18] sm:$0xff]   ;;  %vm449_vm2 = vcmask 64512   ;;  %vm801_vm3 = vcmask 1043456  }
  0x3f   :  { %3644 = vmatprep.subr.bf16.mxu0 %v4294_v0  ;;  %3648 = vmatprep.mubr.msk.bf16.mxu0 %vm4295_vm0, %v4294_v0  ;;  %v103_v5 = vpack.c.bf16 %v99_v4, %v98_v3  ;;  %v96_v7 = vld [vmem:[#allocation2] sm:$0xff]  ;;  %v97_v8 = vld [vmem:[#allocation2 + $0x8] sm:$0xff]  ;;  %v105_v14 = vld [vmem:[#allocation5] sm:$0xff]  ;;  %s4297_s10 = smov 112   ;;  %s4298_s11 = smov 104  }
  0x40   :  { %4038 = vmatpush3.bf16.msra.mxu1 %v4055_v1  ;;  %3645 = vmatpush3.bf16.msra.mxu0 %v4055_v1  ;;  %v102_v9 = vpack.c.bf16 %v97_v8, %v96_v7  ;;  %v100_v10 = vld [vmem:[#allocation2 + $0x20] sm:$0xff]  ;;  %v101_v11 = vld [vmem:[#allocation2 + $0x28] sm:$0xff]  ;;  %v106_v15 = vld [vmem:[#allocation5 + $0x8] sm:$0xff] }
  0x41   :  { %4037 = vmatprep.subr.bf16.mxu1 %v4294_v0  ;;  %3646 = vmatprep.subr.bf16.mxu0 %v4294_v0  ;;  %v4058_v12 = vld [vmem:[#allocation8 + $0x10] sm:$0xff]   ;;  %v104_v13 = vpack.c.bf16 %v101_v11, %v100_v10  ;;  %v111_v16 = vpack.c.bf16 %v106_v15, %v105_v14  ;;  %v108_v18 = vld [vmem:[#allocation5 + $0x18] sm:$0xff]  ;;  %v109_v20 = vld [vmem:[#allocation5 + $0x20] sm:$0xff] }
  0x42   :  { %v107_v17 = vld [vmem:[#allocation5 + $0x10] sm:$0xff]  ;;  %v110_v21 = vld [vmem:[#allocation5 + $0x28] sm:$0xff]  ;;  %v4060_v24 = vld [vmem:[#allocation8 + $0x20] sm:$0xff]  }
  0x43   :  { %v112_v19 = vpack.c.bf16 %v108_v18, %v107_v17  ;;  %v113_v22 = vpack.c.bf16 %v110_v21, %v109_v20  ;;  %v4059_v23 = vld [vmem:[#allocation8 + $0x28] sm:$0xff]   ;;  %v114_v25 = vld [vmem:[#allocation7] sm:$0xff]  ;;  %v115_v26 = vld [vmem:[#allocation7 + $0x8] sm:$0xff] }
  0x44   :  { %4039 = vmatpush3.bf16.msra.mxu1 %v4056_v2  ;;  %3647 = vmatpush3.bf16.msra.mxu0 %v4056_v2  ;;  %v120_v27 = vpack.c.bf16 %v115_v26, %v114_v25  ;;  %v116_v28 = vld [vmem:[#allocation7 + $0x10] sm:$0xff]  ;;  %v117_v29 = vld [vmem:[#allocation7 + $0x18] sm:$0xff]  ;;  %v118_v31 = vld [vmem:[#allocation7 + $0x20] sm:$0xff] }
  0x45   :  { %3660 = vmatprep.subr.bf16.mxu1 %v4294_v0  ;;  %3676 = vmatprep.subr.bf16.mxu0 %v4294_v0  ;;  %v121_v30 = vpack.c.bf16 %v117_v29, %v116_v28  ;;  %v119_v32 = vld [vmem:[#allocation7 + $0x28] sm:$0xff]  ;;  %v3407_v46 = vld [vmem:[%s5095_s4 + $0x1] ss:$0 sm:$0xff]  ;;  %v3400_v51 = vld [vmem:[%s5095_s4] ss:$0 sm:$0xff] }
  0x46   :  { %v122_v33 = vpack.c.bf16 %v119_v32, %v118_v31  ;;  %v3414_v31 = vld [vmem:[%s5095_s4 + $0x2] ss:$0 sm:$0xff]  ;;  %s4296_s4 = smov 120  }
  0x47   :  { %3653 = vmatmul.mubr.msk.bf16.vlgmr.msra.gmra.mxu1 %vm146_vm1, %v103_v5  ;;  %3649 = vmatmul.mubr.msk.bf16.vlgmr.msra.gmra.mxu0 %vm146_vm1, %v102_v9 }
  0x48   :  { %3656 = vmatprep.mubr.msk.bf16.mxu1 %vm4295_vm0, %v4294_v0  ;;  %3661 = vmatpush3.bf16.msra.mxu1 %v4057_v6 }
  0x49   :  { %3662 = vmatprep.subr.bf16.mxu1 %v4294_v0  ;;  %3680 = vmatprep.mubr.msk.bf16.mxu0 %vm4295_vm0, %v4294_v0 }
  0x4a   :  { %3677 = vmatpush3.bf16.msra.mxu0 %v4059_v23 }
  0x4b   :  { %3678 = vmatprep.subr.bf16.mxu0 %v4294_v0 }
  0x4c   :  { %3663 = vmatpush3.bf16.msra.mxu1 %v4058_v12 }
  0x4d   :  { %3692 = vmatprep.subr.bf16.mxu1 %v4294_v0 }
  0x4e   :  { %3679 = vmatpush3.bf16.msra.mxu0 %v4060_v24 }
  0x4f   :  { %3657 = vmatmul.mubr.msk.bf16.gmra.mxu1 %vm146_vm1, %v104_v13  ;;  %3710 = vmatprep.subr.bf16.mxu0 %v4294_v0 }
  0x50   :  { %3664 = vmatprep.mubr.msk.bf16.mxu1 %vm4295_vm0, %v4294_v0 }
  0x51   :  { %3681 = vmatmul.mubr.msk.bf16.vlgmr.msra.gmra.mxu0 %vm146_vm1, %v120_v27 }
  0x52   :  { %3684 = vmatprep.mubr.msk.bf16.mxu0 %vm4295_vm0, %v4294_v0 }
  0x57   :  { %3665 = vmatmul.mubr.msk.bf16.vlgmr.msra.gmra.mxu1 %vm146_vm1, %v111_v16 }
  0x58   :  { %3668 = vmatprep.mubr.msk.bf16.mxu1 %vm4295_vm0, %v4294_v0 }
  0x59   :  { %3685 = vmatmul.mubr.msk.bf16.gmra.mxu0 %vm146_vm1, %v121_v30 }
  0x5a   :  { %3688 = vmatprep.mubr.msk.bf16.mxu0 %vm4295_vm0, %v4294_v0 }
  0x5f   :  { %3669 = vmatmul.mubr.msk.bf16.gmra.mxu1 %vm146_vm1, %v112_v19 }
  0x60   :  { %3672 = vmatprep.mubr.msk.bf16.mxu1 %vm4295_vm0, %v4294_v0 }
  0x61   :  { %3689 = vmatmul.mubr.msk.bf16.gmra.mxu0 %vm146_vm1, %v122_v33 }
  0x62   :  { %3712 = vmatprep.mubr.msk.bf16.mxu0 %vm4295_vm0, %v4294_v0 }
  0x67   :  { %3673 = vmatmul.mubr.msk.bf16.gmra.mxu1 %vm146_vm1, %v113_v22 }
  0x68   :  { %3694 = vmatprep.mubr.msk.bf16.mxu1 %vm4295_vm0, %v4294_v0 }
 0x107   :  { %v198_v34 = vpop.f32.mrf.mxu1  ;;  %v190_v35 = vpop.f32.mrf.mxu0 }
 0x108   :  { %v191_v55 = vadd.f32 %v3400_v51, %v190_v35  ;;  %v199_v16 = vadd.f32 %v3400_v51, %v198_v34 }
 0x109   :  { %v3654_v36 = vpop.f32.mrf.mxu1  ;;  %v3650_v37 = vpop.f32.mrf.mxu0 }
 0x10a   :  { %v4426_v59 = vpack.c.bf16 %v191_v55, %v191_v55  ;;  %v4463_v21 = vpack.c.bf16 %v199_v16, %v199_v16 }
 0x10b   :  { %v201_v38 = vpop.f32.mrf.mxu1  ;;  %v193_v39 = vpop.f32.mrf.mxu0 }
 0x10c   :  { %v194_v5 = vadd.f32 %v3400_v51, %v193_v39  ;;  %v202_v9 = vadd.f32 %v3400_v51, %v201_v38 }
 0x10d   :  { %v3655_v40 = vpop.f32.mrf.mxu1  ;;  %v3651_v41 = vpop.f32.mrf.mxu0 }
 0x10e   :  { %v4441_v10 = vpack.c.bf16 %v194_v5, %v194_v5  ;;  %v4450_v17 = vpack.c.bf16 %v202_v9, %v202_v9 }
 0x10f   :  { %v4411_v42 = vpop.f32.mrf.mxu1 }
 0x110   :  { %v207_v24 = vadd.f32 %v3400_v51, %v4411_v42 }
 0x111   :  { %v3658_v43 = vpop.f32.mrf.mxu1  ;;  %v372_v27 = vpop.f32.mrf.mxu0 }
 0x112   :  { %v4480_v26 = vpack.c.bf16 %v207_v24, %v207_v24  ;;  %v373_v41 = vadd.f32 %v3414_v31, %v372_v27 }
 0x113   :  { %v209_v44 = vpop.f32.mrf.mxu1  ;;  %v3682_v28 = vpop.f32.mrf.mxu0 }
 0x114   :  { %v210_v22 = vadd.f32 %v3400_v51, %v209_v44 }
 0x115   :  { %v3659_v45 = vpop.f32.mrf.mxu1  ;;  %v375_v29 = vpop.f32.mrf.mxu0 }
 0x116   :  { %v4473_v25 = vpack.c.bf16 %v210_v22, %v210_v22  ;;  %v376_v42 = vadd.f32 %v3414_v31, %v375_v29 }
 0x117   :  { %v281_v47 = vpop.f32.mrf.mxu1  ;;  %v3683_v30 = vpop.f32.mrf.mxu0 }
 0x118   :  { %v282_v48 = vadd.f32 %v3407_v46, %v281_v47  ;;  %v4499_v47 = vpack.c.bf16 %v376_v42, %v376_v42 }
 0x119   :  { %v3666_v49 = vpop.f32.mrf.mxu1  ;;  %v380_v32 = vpop.f32.mrf.mxu0 }
 0x11a   :  { %v4416_v50 = vpack.c.bf16 %v282_v48, %v282_v48  ;;  %v4489_v33 = vadd.f32 %v3414_v31, %v380_v32  ;;  %v849_v49 = vsel %vm801_vm3, %v4499_v47, 0 }
 0x11b   :  { %v284_v52 = vpop.f32.mrf.mxu1  ;;  %v3686_v34 = vpop.f32.mrf.mxu0 }
 0x11c   :  { %v285_v53 = vadd.f32 %v3407_v46, %v284_v52  ;;  %v454_v54 = vsel %vm449_vm2, %v4416_v50, 0 }
 0x11d   :  { %v3667_v56 = vpop.f32.mrf.mxu1  ;;  %3693 = vmatpush3.bf16.xpose.msra.mxu1 %v454_v54  ;;  %v383_v35 = vpop.f32.mrf.mxu0 }
 0x11e   :  { %3698 = vmatprep.subr.bf16.mxu1 %v4294_v0  ;;  %v4424_v58 = vpack.c.bf16 %v285_v53, %v285_v53  ;;  %v4491_v36 = vadd.f32 %v3414_v31, %v383_v35 }
 0x11f   :  { %v289_v57 = vpop.f32.mrf.mxu1  ;;  %v3687_v37 = vpop.f32.mrf.mxu0 }
 0x120   :  { %v290_v61 = vadd.f32 %v3407_v46, %v289_v57  ;;  %v500_v1 = vsel %vm449_vm2, %v4424_v58, 0 }
 0x121   :  { %v3670_v60 = vpop.f32.mrf.mxu1  ;;  %v388_v38 = vpop.f32.mrf.mxu0 }
 0x122   :  { %v4434_v3 = vpack.c.bf16 %v290_v61, %v290_v61  ;;  %v4493_v39 = vadd.f32 %v3414_v31, %v388_v38 }
 0x123   :  { %v292_v62 = vpop.f32.mrf.mxu1  ;;  %v3690_v40 = vpop.f32.mrf.mxu0 }
 0x124   :  { %v293_v63 = vadd.f32 %v3407_v46, %v292_v62  ;;  %3695 = vmatmul.mubr.msk.bf16.vlgmr.msra.gmra.mxu1 %vm449_vm2, %v4426_v59  ;;  %v546_v12 = vsel %vm449_vm2, %v4434_v3, 0 }
 0x125   :  { %v3671_v2 = vpop.f32.mrf.mxu1  ;;  %3699 = vmatpush3.bf16.xpose.msra.mxu1 %v500_v1  ;;  %3700 = vmatprep.mubr.msk.bf16.mxu1 %vm4295_vm0, %v4294_v0  ;;  %v391_v43 = vpop.f32.mrf.mxu0 }
 0x126   :  { %v4436_v4 = vpack.c.bf16 %v293_v63, %v293_v63  ;;  %3704 = vmatprep.subr.bf16.mxu1 %v4294_v0  ;;  %v4495_v44 = vadd.f32 %v3414_v31, %v391_v43 }
 0x127   :  { %v297_v6 = vpop.f32.mrf.mxu1  ;;  %v3691_v45 = vpop.f32.mrf.mxu0 }
 0x128   :  { %v592_v7 = vsel %vm449_vm2, %v4436_v4, 0  ;;  %v298_v11 = vadd.f32 %v3407_v46, %v297_v6 }
 0x129   :  { %v3674_v8 = vpop.f32.mrf.mxu1  ;;  %3711 = vmatpush3.bf16.xpose.msra.mxu0 %v592_v7 }
 0x12a   :  { %3722 = vmatprep.subr.bf16.mxu0 %v4294_v0  ;;  %v4452_v18 = vpack.c.bf16 %v298_v11, %v298_v11 }
 0x12b   :  { %v300_v13 = vpop.f32.mrf.mxu1 }
 0x12c   :  { %v301_v14 = vadd.f32 %v3407_v46, %v300_v13  ;;  %3701 = vmatmul.mubr.msk.bf16.vlgmr.msra.gmra.mxu1 %vm449_vm2, %v4441_v10  ;;  %v638_v23 = vsel %vm449_vm2, %v4452_v18, 0  ;;  %v4497_v46 = vpack.c.bf16 %v373_v41, %v373_v41 }
 0x12d   :  { %3705 = vmatpush3.bf16.xpose.msra.mxu1 %v546_v12  ;;  %3706 = vmatprep.mubr.msk.bf16.mxu1 %vm4295_vm0, %v4294_v0  ;;  %v3675_v15 = vpop.f32.mrf.mxu1 }
 0x12e   :  { %v4454_v19 = vpack.c.bf16 %v301_v14, %v301_v14  ;;  %3716 = vmatprep.subr.bf16.mxu1 %v4294_v0  ;;  %v803_v48 = vsel %vm801_vm3, %v4497_v46, 0 }
 0x130   :  { %3713 = vmatmul.mubr.msk.bf16.vlgmr.msra.gmra.mxu0 %vm449_vm2, %v4450_v17  ;;  %v684_v20 = vsel %vm449_vm2, %v4454_v19, 0 }
 0x131   :  { %3723 = vmatpush3.bf16.xpose.msra.mxu0 %v684_v20  ;;  %3724 = vmatprep.mubr.msk.bf16.mxu0 %vm4295_vm0, %v4294_v0 }
 0x132   :  { %3734 = vmatprep.subr.bf16.mxu0 %v4294_v0 }
 0x134   :  { %3707 = vmatmul.mubr.msk.bf16.vlgmr.msra.gmra.mxu1 %vm449_vm2, %v4463_v21 }
 0x135   :  { %3717 = vmatpush3.bf16.xpose.msra.mxu1 %v638_v23  ;;  %3718 = vmatprep.mubr.msk.bf16.mxu1 %vm4295_vm0, %v4294_v0 }
 0x136   :  { %3728 = vmatprep.subr.bf16.mxu1 %v4294_v0 }
 0x138   :  { %3725 = vmatmul.mubr.msk.bf16.vlgmr.msra.gmra.mxu0 %vm449_vm2, %v4473_v25 }
 0x139   :  { %3736 = vmatprep.mubr.msk.bf16.mxu0 %vm4295_vm0, %v4294_v0  ;;  %3735 = vmatpush3.bf16.msra.mxu0 %v849_v49 }
 0x13a   :  { %3746 = vmatprep.subr.bf16.mxu0 %v4294_v0 }
 0x13c   :  { %3719 = vmatmul.mubr.msk.bf16.vlgmr.msra.gmra.mxu1 %vm449_vm2, %v4480_v26 }
 0x13d   :  { %3730 = vmatprep.mubr.msk.bf16.mxu1 %vm4295_vm0, %v4294_v0  ;;  %3729 = vmatpush3.bf16.msra.mxu1 %v803_v48 }
 0x13e   :  { %3740 = vmatprep.subr.bf16.mxu1 %v4294_v0 }
 0x1e4   :  { %v490_v51 = vpop.f32.mrf.mxu1 }
 0x1e5   :  { %v726_v52 = vsel %vm449_vm2, %v490_v51, -inf }
 0x1e6   :  { %727 = vmax.xlane.f32.xlu0 %v726_v52  ;;  %v3696_v53 = vpop.f32.mrf.mxu1 }
 0x1e8   :  { %v493_v54 = vpop.f32.mrf.mxu1 }
 0x1ea   :  { %v3697_v55 = vpop.f32.mrf.mxu1 }
 0x1ec   :  { %v536_v56 = vpop.f32.mrf.mxu1 }
 0x1ed   :  { %v729_v57 = vsel %vm449_vm2, %v536_v56, -inf }
 0x1ee   :  { %730 = vmax.xlane.f32.xlu0 %v729_v57  ;;  %v3702_v60 = vpop.f32.mrf.mxu1 }
 0x1f0   :  { %v539_v61 = vpop.f32.mrf.mxu1  ;;  %v628_v62 = vpop.f32.mrf.mxu0 }
 0x1f1   :  { %v735_v12 = vsel %vm449_vm2, %v628_v62, -inf }
 0x1f2   :  { %v3703_v63 = vpop.f32.mrf.mxu1  ;;  %v3714_v1 = vpop.f32.mrf.mxu0 }
 0x1f4   :  { %v582_v2 = vpop.f32.mrf.mxu1  ;;  %v631_v5 = vpop.f32.mrf.mxu0 }
 0x1f5   :  { %v732_v6 = vsel %vm449_vm2, %v582_v2, -inf }
 0x1f6   :  { %733 = vmax.xlane.f32.xlu1 %v732_v6  ;;  %v3708_v7 = vpop.f32.mrf.mxu1  ;;  %v3715_v8 = vpop.f32.mrf.mxu0 }
 0x1f8   :  { %v585_v9 = vpop.f32.mrf.mxu1  ;;  %v720_v11 = vpop.f32.mrf.mxu0 }
 0x1f9   :  { %v741_v22 = vsel %vm449_vm2, %v720_v11, -inf }
 0x1fa   :  { %v3709_v13 = vpop.f32.mrf.mxu1  ;;  %736 = vmax.xlane.f32.xlu1 %v735_v12  ;;  %v3726_v14 = vpop.f32.mrf.mxu0 }
 0x1fc   :  { %v674_v15 = vpop.f32.mrf.mxu1  ;;  %v723_v16 = vpop.f32.mrf.mxu0 }
 0x1fd   :  { %v738_v20 = vsel %vm449_vm2, %v674_v15, -inf }
 0x1fe   :  { %739 = vmax.xlane.f32.xlu0 %v738_v20  ;;  %v3720_v23 = vpop.f32.mrf.mxu1  ;;  %742 = vmax.xlane.f32.xlu1 %v741_v22  ;;  %v3727_v24 = vpop.f32.mrf.mxu0 }
 0x200   :  { %v677_v27 = vpop.f32.mrf.mxu1 }
 0x202   :  { %v3721_v28 = vpop.f32.mrf.mxu1 }
 0x26f   :  { %v728_v29 = vpop.xlane.xlu0 %727 }
 0x270   :  { %v744_v30 = vsub.f32 %v490_v51, %v728_v29 }
 0x272   :  { %v750_v31 = vmul.f32 1.442695, %v744_v30  ;;  %v4571_v30 = vpack.c.bf16 %v4493_v39, %v4493_v39 }
 0x274   :  { %4061 = vpow2.f32 %v750_v31 }
 0x277   :  { %v731_v32 = vpop.xlane.xlu0 %730 }
 0x278   :  { %v745_v34 = vsub.f32 %v536_v56, %v731_v32 }
 0x27a   :  { %v752_v35 = vmul.f32 1.442695, %v745_v34 }
 0x27c   :  { %4063 = vpow2.f32 %v752_v35  ;;  %v4575_v35 = vpack.c.bf16 %v4495_v44, %v4495_v44 }
 0x27e   :  { %v1033_v44 = vsel %vm801_vm3, %v4575_v35, 0 }
 0x27f   :  { %v734_v37 = vpop.xlane.xlu1 %733 }
 0x280   :  { %v746_v38 = vsub.f32 %v582_v2, %v734_v37  ;;  %v987_v37 = vsel %vm801_vm3, %v4571_v30, 0 }
 0x281   :  { %v4062_v40 = vpop.eup %4061 }
 0x282   :  { %v754_v41 = vmul.f32 1.442695, %v746_v38  ;;  %v762_v42 = vsel %vm449_vm2, %v4062_v40, 0.0 }
 0x283   :  { %763 = vadd.xlane.f32.xlu0 %v762_v42  ;;  %v737_v43 = vpop.xlane.xlu1 %736 }
 0x284   :  { %4065 = vpow2.f32 %v754_v41  ;;  %v747_v45 = vsub.f32 %v628_v62, %v737_v43 }
 0x286   :  { %v756_v48 = vmul.f32 1.442695, %v747_v45 }
 0x287   :  { %v740_v49 = vpop.xlane.xlu0 %739  ;;  %v743_v52 = vpop.xlane.xlu1 %742 }
 0x288   :  { %4067 = vpow2.f32 %v756_v48  ;;  %v748_v51 = vsub.f32 %v674_v15, %v740_v49  ;;  %v749_v53 = vsub.f32 %v720_v11, %v743_v52  ;;  %v4551_v11 = vpack.c.bf16 %v4489_v33, %v4489_v33 }
 0x289   :  { %v4064_v54 = vpop.eup %4063  ;;  %v4561_v33 = vpack.c.bf16 %v4491_v36, %v4491_v36 }
 0x28a   :  { %v758_v55 = vmul.f32 1.442695, %v748_v51  ;;  %v760_v56 = vmul.f32 1.442695, %v749_v53  ;;  %v765_v57 = vsel %vm449_vm2, %v4064_v54, 0.0  ;;  %v895_v15 = vsel %vm801_vm3, %v4551_v11, 0 }
 0x28b   :  { %766 = vadd.xlane.f32.xlu1 %v765_v57  ;;  %v941_v28 = vsel %vm801_vm3, %v4561_v33, 0 }
 0x28c   :  { %4069 = vpow2.f32 %v758_v55 }
 0x28d   :  { %4071 = vpow2.f32 %v760_v56 }
 0x291   :  { %v4066_v60 = vpop.eup %4065 }
 0x292   :  { %v768_v61 = vsel %vm449_vm2, %v4066_v60, 0.0 }
 0x293   :  { %769 = vadd.xlane.f32.xlu0 %v768_v61 }
 0x295   :  { %v4068_v63 = vpop.eup %4067 }
 0x296   :  { %v771_v62 = vsel %vm449_vm2, %v4068_v63, 0.0 }
 0x297   :  { %772 = vadd.xlane.f32.xlu1 %v771_v62 }
 0x299   :  { %v4517_v1 = vpop.eup %4069 }
 0x29a   :  { %v4519_v2 = vpop.eup %4071  ;;  %v774_v5 = vsel %vm449_vm2, %v4517_v1, 0.0 }
 0x29b   :  { %775 = vadd.xlane.f32.xlu0 %v774_v5  ;;  %v777_v6 = vsel %vm449_vm2, %v4519_v2, 0.0 }
 0x29c   :  { %778 = vadd.xlane.f32.xlu1 %v777_v6 }
 0x2ad   :  { %1131 = vrot.lane.b32.xlu1 %v4424_v58, %s4296_s4 }
 0x2b1   :  { %1079 = vrot.lane.b32.xlu1 %v4426_v59, %s4296_s4  ;;  %1081 = vrot.lane.b32.xlu0 %v4416_v50, %s4296_s4 }
 0x2b5   :  { %1129 = vrot.lane.b32.xlu1 %v4441_v10, %s4296_s4  ;;  %1181 = vrot.lane.b32.xlu0 %v4434_v3, %s4296_s4 }
 0x2b9   :  { %1231 = vrot.lane.b32.xlu1 %v4436_v4, %s4296_s4  ;;  %1179 = vrot.lane.b32.xlu0 %v4463_v21, %s4296_s4 }
 0x2bd   :  { %1229 = vrot.lane.b32.xlu1 %v4450_v17, %s4296_s4  ;;  %1281 = vrot.lane.b32.xlu0 %v4452_v18, %s4296_s4 }
 0x2c1   :  { %1331 = vrot.lane.b32.xlu1 %v4454_v19, %s4296_s4  ;;  %1279 = vrot.lane.b32.xlu0 %v4480_v26, %s4296_s4 }
 0x2c5   :  { %1329 = vrot.lane.b32.xlu1 %v4473_v25, %s4296_s4 }
 0x30c   :  { %v764_v7 = vpop.xlane.xlu0 %763 }
 0x30d   :  { %4073 = vrcp.f32 %v764_v7 }
 0x314   :  { %v767_v8 = vpop.xlane.xlu1 %766 }
 0x315   :  { %4075 = vrcp.f32 %v767_v8 }
 0x31a   :  { %v4074_v9 = vpop.eup %4073 }
 0x31b   :  { %v786_v12 = vmul.f32 %v4074_v9, %v4062_v40 }
 0x31c   :  { %v770_v13 = vpop.xlane.xlu0 %769 }
 0x31d   :  { %4077 = vrcp.f32 %v770_v13  ;;  %v792_v14 = vpack.c.bf16 %v786_v12, %v786_v12 }
 0x31f   :  { %3731 = vmatmul.mubr.msk.bf16.vlgmr.msra.gmra.mxu1 %vm449_vm2, %v792_v14 }
 0x320   :  { %3741 = vmatpush3.bf16.msra.mxu1 %v895_v15  ;;  %v773_v16 = vpop.xlane.xlu1 %772  ;;  %3742 = vmatprep.mubr.msk.bf16.mxu1 %vm4295_vm0, %v4294_v0 }
 0x321   :  { %4079 = vrcp.f32 %v773_v16  ;;  %3752 = vmatprep.subr.bf16.mxu1 %v4294_v0 }
 0x322   :  { %v4076_v20 = vpop.eup %4075 }
 0x323   :  { %v787_v22 = vmul.f32 %v4076_v20, %v4064_v54 }
 0x324   :  { %v776_v23 = vpop.xlane.xlu0 %775 }
 0x325   :  { %4081 = vrcp.f32 %v776_v23  ;;  %v779_v24 = vpop.xlane.xlu1 %778  ;;  %v793_v27 = vpack.c.bf16 %v787_v22, %v787_v22 }
 0x326   :  { %4083 = vrcp.f32 %v779_v24 }
 0x327   :  { %3737 = vmatmul.mubr.msk.bf16.vlgmr.msra.gmra.mxu0 %vm449_vm2, %v793_v27 }
 0x328   :  { %3747 = vmatpush3.bf16.msra.mxu0 %v941_v28  ;;  %3748 = vmatprep.mubr.msk.bf16.mxu0 %vm4295_vm0, %v4294_v0  ;;  %v1082_v42 = vpop.permute.xlu0 %1081 }
 0x329   :  { %3758 = vmatprep.subr.bf16.mxu0 %v4294_v0  ;;  %v1132_v36 = vpop.permute.xlu1 %1131  ;;  %v1087_v51 = vsel %vm449_vm2, %v1082_v42, 0 }
 0x32a   :  { %v4078_v29 = vpop.eup %4077  ;;  %v1137_v55 = vsel %vm449_vm2, %v1132_v36, 0 }
 0x32b   :  { %v788_v31 = vmul.f32 %v4078_v29, %v4066_v60 }
 0x32c   :  { %v1182_v53 = vpop.permute.xlu0 %1181 }
 0x32d   :  { %v794_v32 = vpack.c.bf16 %v788_v31, %v788_v31  ;;  %v1080_v40 = vpop.permute.xlu1 %1079  ;;  %v1187_v60 = vsel %vm449_vm2, %v1182_v53, 0 }
 0x32e   :  { %v4080_v34 = vpop.eup %4079 }
 0x32f   :  { %3743 = vmatmul.mubr.msk.bf16.vlgmr.msra.gmra.mxu1 %vm449_vm2, %v794_v32  ;;  %v789_v38 = vmul.f32 %v4080_v34, %v4068_v63 }
 0x330   :  { %3753 = vmatpush3.bf16.msra.mxu1 %v987_v37  ;;  %3754 = vmatprep.mubr.msk.bf16.mxu1 %vm4295_vm0, %v4294_v0  ;;  %v1180_v57 = vpop.permute.xlu0 %1179 }
 0x331   :  { %v795_v39 = vpack.c.bf16 %v789_v38, %v789_v38  ;;  %3764 = vmatprep.subr.bf16.mxu1 %v4294_v0  ;;  %v1130_v52 = vpop.permute.xlu1 %1129 }
 0x332   :  { %v4082_v41 = vpop.eup %4081 }
 0x333   :  { %v4084_v43 = vpop.eup %4083  ;;  %3749 = vmatmul.mubr.msk.bf16.vlgmr.msra.gmra.mxu0 %vm449_vm2, %v795_v39  ;;  %v790_v45 = vmul.f32 %v4082_v41, %v4517_v1 }
 0x334   :  { %3759 = vmatpush3.bf16.msra.mxu0 %v1033_v44  ;;  %3760 = vmatprep.mubr.msk.bf16.mxu0 %vm4295_vm0, %v4294_v0  ;;  %v791_v49 = vmul.f32 %v4084_v43, %v4519_v2  ;;  %v1282_v62 = vpop.permute.xlu0 %1281 }
 0x335   :  { %v796_v48 = vpack.c.bf16 %v790_v45, %v790_v45  ;;  %3770 = vmatprep.subr.bf16.mxu0 %v4294_v0  ;;  %v1232_v56 = vpop.permute.xlu1 %1231  ;;  %v1287_v1 = vsel %vm449_vm2, %v1282_v62, 0 }
 0x336   :  { %v797_v54 = vpack.c.bf16 %v791_v49, %v791_v49  ;;  %v1237_v63 = vsel %vm449_vm2, %v1232_v56, 0 }
 0x337   :  { %3755 = vmatmul.mubr.msk.bf16.vlgmr.msra.gmra.mxu1 %vm449_vm2, %v796_v48 }
 0x338   :  { %3765 = vmatpush3.bf16.xpose.msra.mxu1 %v1087_v51  ;;  %3766 = vmatprep.mubr.msk.bf16.mxu1 %vm4295_vm0, %v4294_v0  ;;  %v1280_v6 = vpop.permute.xlu0 %1279 }
 0x339   :  { %3776 = vmatprep.subr.bf16.mxu1 %v4294_v0  ;;  %v1230_v61 = vpop.permute.xlu1 %1229 }
 0x33b   :  { %3761 = vmatmul.mubr.msk.bf16.vlgmr.msra.gmra.mxu0 %vm449_vm2, %v797_v54 }
 0x33c   :  { %3771 = vmatpush3.bf16.xpose.msra.mxu0 %v1137_v55  ;;  %3772 = vmatprep.mubr.msk.bf16.mxu0 %vm4295_vm0, %v4294_v0 }
 0x33d   :  { %3782 = vmatprep.subr.bf16.mxu0 %v4294_v0  ;;  %v1332_v2 = vpop.permute.xlu1 %1331 }
 0x33e   :  { %v1337_v5 = vsel %vm449_vm2, %v1332_v2, 0 }
 0x33f   :  { %3767 = vmatmul.mubr.msk.bf16.vlgmr.msra.gmra.mxu1 %vm449_vm2, %v1080_v40 }
 0x340   :  { %3777 = vmatpush3.bf16.xpose.msra.mxu1 %v1187_v60  ;;  %3778 = vmatprep.mubr.msk.bf16.mxu1 %vm4295_vm0, %v4294_v0 }
 0x341   :  { %3788 = vmatprep.subr.bf16.mxu1 %v4294_v0  ;;  %v1330_v7 = vpop.permute.xlu1 %1329 }
 0x343   :  { %3773 = vmatmul.mubr.msk.bf16.vlgmr.msra.gmra.mxu0 %vm449_vm2, %v1130_v52 }
 0x344   :  { %3783 = vmatpush3.bf16.xpose.msra.mxu0 %v1237_v63  ;;  %3784 = vmatprep.mubr.msk.bf16.mxu0 %vm4295_vm0, %v4294_v0 }
 0x345   :  { %3794 = vmatprep.subr.bf16.mxu0 %v4294_v0 }
 0x347   :  { %3779 = vmatmul.mubr.msk.bf16.vlgmr.msra.gmra.mxu1 %vm449_vm2, %v1180_v57 }
 0x348   :  { %3789 = vmatpush3.bf16.xpose.msra.mxu1 %v1287_v1  ;;  %3790 = vmatprep.mubr.msk.bf16.mxu1 %vm4295_vm0, %v4294_v0 }
 0x349   :  { %3800 = vmatprep.subr.bf16.mxu1 %v4294_v0 }
 0x34b   :  { %3785 = vmatmul.mubr.msk.bf16.vlgmr.msra.gmra.mxu0 %vm449_vm2, %v1230_v61 }
 0x34c   :  { %3795 = vmatpush3.bf16.xpose.msra.mxu0 %v1337_v5  ;;  %3796 = vmatprep.mubr.msk.bf16.mxu0 %vm4295_vm0, %v4294_v0 }
 0x34d   :  { %3806 = vmatprep.subr.bf16.mxu0 %v4294_v0 }
 0x34f   :  { %3791 = vmatmul.mubr.msk.bf16.vlgmr.msra.gmra.mxu1 %vm449_vm2, %v1280_v6 }
 0x350   :  { %3802 = vmatprep.mubr.msk.bf16.mxu1 %vm4295_vm0, %v4294_v0 }
 0x353   :  { %3797 = vmatmul.mubr.msk.bf16.vlgmr.msra.gmra.mxu0 %vm449_vm2, %v1330_v7 }
 0x354   :  { %3808 = vmatprep.mubr.msk.bf16.mxu0 %vm4295_vm0, %v4294_v0 }
 0x3df   :  { %v4627_v8 = vpop.f32.mrf.mxu1 }
 0x3e1   :  { %v3732_v9 = vpop.f32.mrf.mxu1 }
 0x3e3   :  { %v842_v12 = vpop.f32.mrf.mxu1 }
 0x3e5   :  { %v3733_v13 = vpop.f32.mrf.mxu1 }
 0x3e7   :  { %v4629_v14 = vpop.f32.mrf.mxu0 }
 0x3e8   :  { %v1075_v15 = vpack.c.bf16 %v4629_v14, %v4627_v8 }
 0x3e9   :  { %v3738_v16 = vpop.f32.mrf.mxu0 }
 0x3eb   :  { %v888_v20 = vpop.f32.mrf.mxu0 }
 0x3ed   :  { %v3739_v22 = vpop.f32.mrf.mxu0 }
 0x3ef   :  { %v4633_v23 = vpop.f32.mrf.mxu1 }
 0x3f1   :  { %v3744_v24 = vpop.f32.mrf.mxu1 }
 0x3f3   :  { %v934_v27 = vpop.f32.mrf.mxu1  ;;  %v4635_v28 = vpop.f32.mrf.mxu0 }
 0x3f4   :  { %v1076_v29 = vpack.c.bf16 %v4635_v28, %v4633_v23 }
 0x3f5   :  { %v3745_v36 = vpop.f32.mrf.mxu1  ;;  %v3750_v31 = vpop.f32.mrf.mxu0 }
 0x3f7   :  { %v980_v32 = vpop.f32.mrf.mxu0  ;;  %v4639_v34 = vpop.f32.mrf.mxu1 }
 0x3f9   :  { %v3751_v37 = vpop.f32.mrf.mxu0  ;;  %v3756_v38 = vpop.f32.mrf.mxu1 }
 0x3fb   :  { %v1026_v40 = vpop.f32.mrf.mxu1  ;;  %v4641_v39 = vpop.f32.mrf.mxu0 }
 0x3fc   :  { %v1077_v41 = vpack.c.bf16 %v4641_v39, %v4639_v34 }
 0x3fd   :  { %v3757_v42 = vpop.f32.mrf.mxu1  ;;  %v3762_v43 = vpop.f32.mrf.mxu0 }
 0x3ff   :  { %v1072_v44 = vpop.f32.mrf.mxu0  ;;  %v1123_v45 = vpop.f32.mrf.mxu1 }
 0x400   :  { %v1379_v48 = vsel %vm449_vm2, %v1123_v45, -inf }
 0x401   :  { %1380 = vmax.xlane.f32.xlu0 %v1379_v48  ;;  %v3763_v49 = vpop.f32.mrf.mxu0  ;;  %v3768_v52 = vpop.f32.mrf.mxu1 }
 0x403   :  { %v1126_v51 = vpop.f32.mrf.mxu1  ;;  %v1173_v53 = vpop.f32.mrf.mxu0 }
 0x404   :  { %v1382_v54 = vsel %vm449_vm2, %v1173_v53, -inf }
 0x405   :  { %v3769_v55 = vpop.f32.mrf.mxu1  ;;  %1383 = vmax.xlane.f32.xlu1 %v1382_v54  ;;  %v3774_v56 = vpop.f32.mrf.mxu0 }
 0x407   :  { %v1176_v57 = vpop.f32.mrf.mxu0  ;;  %v4647_v60 = vpop.f32.mrf.mxu1 }
 0x408   :  { %v1385_v61 = vsel %vm449_vm2, %v4647_v60, -inf }
 0x409   :  { %1386 = vmax.xlane.f32.xlu0 %v1385_v61  ;;  %v3775_v63 = vpop.f32.mrf.mxu0  ;;  %v3780_v62 = vpop.f32.mrf.mxu1 }
 0x40b   :  { %v1226_v1 = vpop.f32.mrf.mxu1  ;;  %v1273_v2 = vpop.f32.mrf.mxu0 }
 0x40c   :  { %v1388_v5 = vsel %vm449_vm2, %v1273_v2, -inf }
 0x40d   :  { %v3781_v6 = vpop.f32.mrf.mxu1  ;;  %1389 = vmax.xlane.f32.xlu0 %v1388_v5  ;;  %v3786_v7 = vpop.f32.mrf.mxu0 }
 0x40f   :  { %v1276_v9 = vpop.f32.mrf.mxu0  ;;  %v1323_v12 = vpop.f32.mrf.mxu1 }
 0x410   :  { %v1391_v13 = vsel %vm449_vm2, %v1323_v12, -inf }
 0x411   :  { %v3792_v16 = vpop.f32.mrf.mxu1  ;;  %1392 = vmax.xlane.f32.xlu0 %v1391_v13  ;;  %v3787_v20 = vpop.f32.mrf.mxu0 }
 0x413   :  { %v1326_v22 = vpop.f32.mrf.mxu1  ;;  %v1373_v24 = vpop.f32.mrf.mxu0 }
 0x414   :  { %v1394_v27 = vsel %vm449_vm2, %v1373_v24, -inf }
 0x415   :  { %v3793_v36 = vpop.f32.mrf.mxu1  ;;  %1395 = vmax.xlane.f32.xlu1 %v1394_v27  ;;  %v3798_v31 = vpop.f32.mrf.mxu0 }
 0x417   :  { %v1376_v32 = vpop.f32.mrf.mxu0 }
 0x419   :  { %v3799_v37 = vpop.f32.mrf.mxu0 }
 0x426   :  { %1499 = vrot.lane.b32.xlu1 %v4499_v47, %s4296_s4 }
 0x42a   :  { %1547 = vrot.lane.b32.xlu1 %v4551_v11, %s4296_s4 }
 0x42e   :  { %1595 = vrot.lane.b32.xlu1 %v4561_v33, %s4296_s4 }
 0x48a   :  { %v1381_v38 = vpop.xlane.xlu0 %1380 }
 0x48b   :  { %v1397_v40 = vsub.f32 %v1123_v45, %v1381_v38 }
 0x48d   :  { %v1403_v42 = vmul.f32 1.442695, %v1397_v40 }
 0x48e   :  { %v1384_v43 = vpop.xlane.xlu1 %1383 }
 0x48f   :  { %4085 = vpow2.f32 %v1403_v42  ;;  %v1398_v44 = vsub.f32 %v1173_v53, %v1384_v43 }
 0x491   :  { %v1405_v48 = vmul.f32 1.442695, %v1398_v44 }
 0x492   :  { %v1387_v49 = vpop.xlane.xlu0 %1386 }
 0x493   :  { %4087 = vpow2.f32 %v1405_v48  ;;  %v1399_v9 = vsub.f32 %v4647_v60, %v1387_v49 }
 0x495   :  { %v1407_v16 = vmul.f32 1.442695, %v1399_v9 }
 0x496   :  { %v1390_v52 = vpop.xlane.xlu0 %1389 }
 0x497   :  { %v1400_v51 = vsub.f32 %v1273_v2, %v1390_v52 }
 0x499   :  { %v1409_v54 = vmul.f32 1.442695, %v1400_v51 }
 0x49a   :  { %v1393_v13 = vpop.xlane.xlu0 %1392 }
 0x49b   :  { %4089 = vpow2.f32 %v1409_v54  ;;  %v1401_v20 = vsub.f32 %v1323_v12, %v1393_v13 }
 0x49c   :  { %v4086_v55 = vpop.eup %4085 }
 0x49d   :  { %v1415_v56 = vsel %vm449_vm2, %v4086_v55, 0.0  ;;  %v1411_v22 = vmul.f32 1.442695, %v1401_v20 }
 0x49e   :  { %1416 = vadd.xlane.f32.xlu0 %v1415_v56  ;;  %v1396_v57 = vpop.xlane.xlu1 %1395 }
 0x49f   :  { %v1402_v61 = vsub.f32 %v1373_v24, %v1396_v57 }
 0x4a0   :  { %v4088_v63 = vpop.eup %4087 }
 0x4a1   :  { %v1413_v62 = vmul.f32 1.442695, %v1402_v61  ;;  %v1418_v45 = vsel %vm449_vm2, %v4088_v63, 0.0 }
 0x4a2   :  { %1419 = vadd.xlane.f32.xlu1 %v1418_v45  ;;  %v1500_v1 = vpop.permute.xlu1 %1499 }
 0x4a3   :  { %4091 = vpow2.f32 %v1413_v62  ;;  %v1505_v53 = vsel %vm801_vm3, %v1500_v1, 0 }
 0x4a4   :  { %3807 = vmatpush3.bf16.msra.mxu0 %v1505_v53  ;;  %4093 = vpow2.f32 %v1407_v16  ;;  %v1078_v53 = vld [vmem:[#allocation10] sm:$0xf] }
 0x4a5   :  { %3818 = vmatprep.subr.bf16.mxu0 %v4294_v0  ;;  %4095 = vpow2.f32 %v1411_v22  ;;  %v1823_v9 = vsel %vm801_vm3, %v1078_v53, 0 }
 0x4a6   :  { %v1548_v36 = vpop.permute.xlu1 %1547 }
 0x4a7   :  { %v1553_v52 = vsel %vm801_vm3, %v1548_v36, 0 }
 0x4a8   :  { %v4664_v2 = vpop.eup %4089 }
 0x4a9   :  { %v1424_v5 = vsel %vm449_vm2, %v4664_v2, 0.0 }
 0x4aa   :  { %1425 = vadd.xlane.f32.xlu1 %v1424_v5  ;;  %v1596_v31 = vpop.permute.xlu1 %1595 }
 0x4ab   :  { %v1601_v57 = vsel %vm801_vm3, %v1596_v31, 0 }
 0x4b0   :  { %v4668_v6 = vpop.eup %4091 }
 0x4b1   :  { %v1430_v7 = vsel %vm449_vm2, %v4668_v6, 0.0  ;;  %v4681_v24 = vpop.eup %4093 }
 0x4b2   :  { %1431 = vadd.xlane.f32.xlu1 %v1430_v7  ;;  %v1421_v60 = vsel %vm449_vm2, %v4681_v24, 0.0  ;;  %v4687_v12 = vpop.eup %4095 }
 0x4b3   :  { %v1427_v27 = vsel %vm449_vm2, %v4687_v12, 0.0 }
 0x4b4   :  { %1451 = vrot.lane.b32.xlu0 %v4497_v46, %s4296_s4 }
 0x4c3   :  { %1691 = vrot.lane.b32.xlu1 %v4575_v35, %s4296_s4 }
 0x4c7   :  { %1934 = vrot.lane.b32.xlu1 %v4424_v58, %s4297_s10 }
 0x4cb   :  { %1932 = vrot.lane.b32.xlu1 %v4441_v10, %s4297_s10 }
 0x4cf   :  { %2034 = vrot.lane.b32.xlu1 %v4436_v4, %s4297_s10 }
 0x4d3   :  { %1422 = vadd.xlane.f32.xlu0 %v1421_v60  ;;  %2032 = vrot.lane.b32.xlu1 %v4450_v17, %s4297_s10 }
 0x4d7   :  { %1428 = vadd.xlane.f32.xlu0 %v1427_v27  ;;  %2134 = vrot.lane.b32.xlu1 %v4454_v19, %s4297_s10 }
 0x4db   :  { %2132 = vrot.lane.b32.xlu1 %v4473_v25, %s4297_s10 }
 0x4ed   :  { %1643 = vrot.lane.b32.xlu0 %v4571_v30, %s4296_s4 }
 0x4f1   :  { %1884 = vrot.lane.b32.xlu0 %v4416_v50, %s4297_s10 }
 0x4f5   :  { %1882 = vrot.lane.b32.xlu0 %v4426_v59, %s4297_s10 }
 0x4f9   :  { %1984 = vrot.lane.b32.xlu0 %v4434_v3, %s4297_s10 }
 0x4fd   :  { %1982 = vrot.lane.b32.xlu0 %v4463_v21, %s4297_s10 }
 0x501   :  { %2084 = vrot.lane.b32.xlu0 %v4452_v18, %s4297_s10 }
 0x505   :  { %2082 = vrot.lane.b32.xlu0 %v4480_v26, %s4297_s10 }
 0x527   :  { %v1417_v32 = vpop.xlane.xlu0 %1416 }
 0x528   :  { %4097 = vrcp.f32 %v1417_v32 }
 0x52b   :  { %v1452_v37 = vpop.permute.xlu0 %1451  ;;  %v1420_v38 = vpop.xlane.xlu1 %1419 }
 0x52c   :  { %v1457_v40 = vsel %vm801_vm3, %v1452_v37, 0  ;;  %4099 = vrcp.f32 %v1420_v38 }
 0x52d   :  { %3801 = vmatpush3.bf16.msra.mxu1 %v1457_v40 }
 0x52e   :  { %3812 = vmatprep.subr.bf16.mxu1 %v4294_v0 }
 0x533   :  { %v1426_v42 = vpop.xlane.xlu1 %1425 }
 0x534   :  { %4101 = vrcp.f32 %v1426_v42 }
 0x535   :  { %v4098_v43 = vpop.eup %4097 }
 0x536   :  { %v1439_v44 = vmul.f32 %v4098_v43, %v4086_v55 }
 0x538   :  { %v1445_v48 = vpack.c.bf16 %v1439_v44, %v1439_v44 }
 0x539   :  { %v4100_v49 = vpop.eup %4099 }
 0x53a   :  { %3803 = vmatmul.mubr.msk.bf16.vlgmr.msra.gmra.mxu1 %vm449_vm2, %v1445_v48  ;;  %v1440_v51 = vmul.f32 %v4100_v49, %v4088_v63 }
 0x53b   :  { %3813 = vmatpush3.bf16.msra.mxu1 %v1553_v52  ;;  %v1432_v54 = vpop.xlane.xlu1 %1431  ;;  %3814 = vmatprep.mubr.msk.bf16.mxu1 %vm4295_vm0, %v4294_v0 }
 0x53c   :  { %4103 = vrcp.f32 %v1432_v54  ;;  %v1446_v56 = vpack.c.bf16 %v1440_v51, %v1440_v51  ;;  %3824 = vmatprep.subr.bf16.mxu1 %v4294_v0 }
 0x53e   :  { %3809 = vmatmul.mubr.msk.bf16.vlgmr.msra.gmra.mxu0 %vm449_vm2, %v1446_v56 }
 0x53f   :  { %3819 = vmatpush3.bf16.msra.mxu0 %v1601_v57  ;;  %3820 = vmatprep.mubr.msk.bf16.mxu0 %vm4295_vm0, %v4294_v0  ;;  %v1692_v63 = vpop.permute.xlu1 %1691 }
 0x540   :  { %3830 = vmatprep.subr.bf16.mxu0 %v4294_v0  ;;  %v1697_v45 = vsel %vm801_vm3, %v1692_v63, 0 }
 0x541   :  { %v4102_v55 = vpop.eup %4101 }
 0x542   :  { %v1442_v61 = vmul.f32 %v4102_v55, %v4664_v2 }
 0x543   :  { %v1935_v2 = vpop.permute.xlu1 %1934 }
 0x544   :  { %v1448_v62 = vpack.c.bf16 %v1442_v61, %v1442_v61  ;;  %v1940_v13 = vsel %vm449_vm2, %v1935_v2, 0 }
 0x546   :  { %3821 = vmatmul.mubr.msk.bf16.vlgmr.msra.gmra.mxu0 %vm449_vm2, %v1448_v62 }
 0x547   :  { %3831 = vmatpush3.bf16.msra.mxu0 %v1697_v45  ;;  %3832 = vmatprep.mubr.msk.bf16.mxu0 %vm4295_vm0, %v4294_v0  ;;  %v1933_v8 = vpop.permute.xlu1 %1932 }
 0x548   :  { %3850 = vmatprep.subr.bf16.mxu0 %v4294_v0 }
 0x549   :  { %v4104_v1 = vpop.eup %4103 }
 0x54a   :  { %v1444_v5 = vmul.f32 %v4104_v1, %v4668_v6 }
 0x54b   :  { %v2035_v14 = vpop.permute.xlu1 %2034 }
 0x54c   :  { %v1450_v7 = vpack.c.bf16 %v1444_v5, %v1444_v5  ;;  %v2040_v60 = vsel %vm449_vm2, %v2035_v14, 0 }
 0x54e   :  { %3833 = vmatmul.mubr.msk.bf16.vlgmr.msra.gmra.mxu0 %vm449_vm2, %v1450_v7 }
 0x54f   :  { %3851 = vmatpush3.bf16.msra.mxu0 %v1823_v9  ;;  %3852 = vmatprep.mubr.msk.bf16.mxu0 %vm4295_vm0, %v4294_v0 }
 0x550   :  { %3870 = vmatprep.subr.bf16.mxu0 %v4294_v0 }
 0x556   :  { %3853 = vmatmul.mubr.msk.bf16.vlgmr.msra.gmra.mxu0 %vm449_vm2, %v1075_v15 }
 0x557   :  { %3871 = vmatpush3.bf16.xpose.msra.mxu0 %v1940_v13  ;;  %3856 = vmatprep.mubr.msk.bf16.mxu0 %vm4295_vm0, %v4294_v0 }
 0x558   :  { %3882 = vmatprep.subr.bf16.mxu0 %v4294_v0 }
 0x55c   :  { %v1423_v6 = vpop.xlane.xlu0 %1422 }
 0x55d   :  { %4105 = vrcp.f32 %v1423_v6 }
 0x55e   :  { %3857 = vmatmul.mubr.msk.bf16.gmra.mxu0 %vm449_vm2, %v1076_v29  ;;  %v2033_v29 = vpop.permute.xlu1 %2032 }
 0x55f   :  { %3860 = vmatprep.mubr.msk.bf16.mxu0 %vm4295_vm0, %v4294_v0 }
 0x560   :  { %v1429_v16 = vpop.xlane.xlu0 %1428 }
 0x561   :  { %4107 = vrcp.f32 %v1429_v16 }
 0x562   :  { %v2135_v39 = vpop.permute.xlu1 %2134 }
 0x564   :  { %v1644_v28 = vpop.permute.xlu0 %1643 }
 0x565   :  { %v1649_v27 = vsel %vm801_vm3, %v1644_v28, 0 }
 0x566   :  { %3861 = vmatmul.mubr.msk.bf16.gmra.mxu0 %vm449_vm2, %v1077_v41  ;;  %v2133_v36 = vpop.permute.xlu1 %2132 }
 0x567   :  { %3872 = vmatprep.mubr.msk.bf16.mxu0 %vm4295_vm0, %v4294_v0 }
 0x568   :  { %v1885_v38 = vpop.permute.xlu0 %1884 }
 0x569   :  { %v1890_v49 = vsel %vm449_vm2, %v1885_v38, 0 }
 0x56a   :  { %v4106_v15 = vpop.eup %4105 }
 0x56b   :  { %v1441_v23 = vmul.f32 %v4106_v15, %v4681_v24  ;;  %v2140_v24 = vsel %vm449_vm2, %v2135_v39, 0 }
 0x56d   :  { %v1447_v20 = vpack.c.bf16 %v1441_v23, %v1441_v23 }
 0x56e   :  { %v4108_v22 = vpop.eup %4107  ;;  %3873 = vmatmul.mubr.msk.bf16.vlgmr.msra.gmra.mxu0 %vm449_vm2, %v1933_v8 }
 0x56f   :  { %3883 = vmatpush3.bf16.xpose.msra.mxu0 %v2040_v60  ;;  %3815 = vmatmul.mubr.msk.bf16.vlgmr.msra.gmra.mxu1 %vm449_vm2, %v1447_v20  ;;  %v1443_v34 = vmul.f32 %v4108_v22, %v4687_v12  ;;  %v1743_v12 = vld [vmem:[#allocation10 + $0x4] sm:$0xf] }
 0x570   :  { %3825 = vmatpush3.bf16.msra.mxu1 %v1649_v27  ;;  %3884 = vmatprep.mubr.msk.bf16.mxu0 %vm4295_vm0, %v4294_v0  ;;  %v1754_v31 = vsel %vm801_vm3, %v1743_v12, 0 }
 0x571   :  { %3894 = vmatprep.subr.bf16.mxu0 %v4294_v0  ;;  %3826 = vmatprep.mubr.msk.bf16.mxu1 %vm4295_vm0, %v4294_v0  ;;  %v1449_v41 = vpack.c.bf16 %v1443_v34, %v1443_v34 }
 0x572   :  { %3836 = vmatprep.subr.bf16.mxu1 %v4294_v0 }
 0x576   :  { %3885 = vmatmul.mubr.msk.bf16.vlgmr.msra.gmra.mxu0 %vm449_vm2, %v2033_v29 }
 0x577   :  { %3895 = vmatpush3.bf16.xpose.msra.mxu0 %v2140_v24  ;;  %3827 = vmatmul.mubr.msk.bf16.vlgmr.msra.gmra.mxu1 %vm449_vm2, %v1449_v41  ;;  %v1883_v41 = vpop.permute.xlu0 %1882 }
 0x578   :  { %3896 = vmatprep.mubr.msk.bf16.mxu0 %vm4295_vm0, %v4294_v0  ;;  %3838 = vmatprep.mubr.msk.bf16.mxu1 %vm4295_vm0, %v4294_v0 }
 0x579   :  { %3906 = vmatprep.subr.bf16.mxu0 %v4294_v0  ;;  %3837 = vmatpush3.bf16.msra.mxu1 %v1754_v31 }
 0x57a   :  { %3864 = vmatprep.subr.bf16.mxu1 %v4294_v0 }
 0x57e   :  { %3897 = vmatmul.mubr.msk.bf16.vlgmr.msra.gmra.mxu0 %vm449_vm2, %v2133_v36 }
 0x57f   :  { %3908 = vmatprep.mubr.msk.bf16.mxu0 %vm4295_vm0, %v4294_v0 }
 0x5fa   :  { %v1493_v32 = vpop.f32.mrf.mxu1 }
 0x5fc   :  { %v3804_v37 = vpop.f32.mrf.mxu1 }
 0x5fe   :  { %v1496_v40 = vpop.f32.mrf.mxu1  ;;  %v1541_v42 = vpop.f32.mrf.mxu0 }
 0x5ff   :  { %v1739_v43 = vpack.c.bf16 %v1541_v42, %v1493_v32  ;;  %v1985_v40 = vpop.permute.xlu0 %1984 }
 0x600   :  { %v3805_v44 = vpop.f32.mrf.mxu1  ;;  %v3810_v48 = vpop.f32.mrf.mxu0 }
 0x601   :  { %3839 = vmatmul.mubr.msk.bf16.vlgmr.msra.gmra.mxu1 %vm449_vm2, %v1739_v43 }
 0x602   :  { %3865 = vmatpush3.bf16.xpose.msra.mxu1 %v1890_v49  ;;  %v1544_v52 = vpop.f32.mrf.mxu0  ;;  %3842 = vmatprep.mubr.msk.bf16.mxu1 %vm4295_vm0, %v4294_v0 }
 0x603   :  { %3876 = vmatprep.subr.bf16.mxu1 %v4294_v0 }
 0x604   :  { %v3811_v51 = vpop.f32.mrf.mxu0 }
 0x605   :  { %v1983_v51 = vpop.permute.xlu0 %1982 }
 0x606   :  { %v1637_v54 = vpop.f32.mrf.mxu0 }
 0x608   :  { %v3822_v56 = vpop.f32.mrf.mxu0 }
 0x60a   :  { %v1640_v57 = vpop.f32.mrf.mxu0 }
 0x60c   :  { %v3823_v55 = vpop.f32.mrf.mxu0 }
 0x60d   :  { %v2085_v55 = vpop.permute.xlu0 %2084 }
 0x60e   :  { %v1733_v61 = vpop.f32.mrf.mxu0 }
 0x610   :  { %v3834_v63 = vpop.f32.mrf.mxu0 }
 0x611   :  { %v2083_v63 = vpop.permute.xlu0 %2082 }
 0x612   :  { %v1736_v62 = vpop.f32.mrf.mxu0 }
 0x614   :  { %v3835_v45 = vpop.f32.mrf.mxu0 }
 0x616   :  { %v4785_v1 = vpop.f32.mrf.mxu0 }
 0x618   :  { %v3854_v53 = vpop.f32.mrf.mxu0 }
 0x61a   :  { %v4787_v5 = vpop.f32.mrf.mxu0 }
 0x61c   :  { %v3855_v7 = vpop.f32.mrf.mxu0 }
 0x61e   :  { %v4789_v9 = vpop.f32.mrf.mxu0 }
 0x620   :  { %v3858_v2 = vpop.f32.mrf.mxu0 }
 0x622   :  { %v4791_v13 = vpop.f32.mrf.mxu0 }
 0x624   :  { %v3859_v6 = vpop.f32.mrf.mxu0 }
 0x626   :  { %v4793_v16 = vpop.f32.mrf.mxu0 }
 0x628   :  { %v3862_v8 = vpop.f32.mrf.mxu0 }
 0x62a   :  { %v4795_v14 = vpop.f32.mrf.mxu0 }
 0x62c   :  { %v3863_v15 = vpop.f32.mrf.mxu0 }
 0x62e   :  { %v1976_v23 = vpop.f32.mrf.mxu0 }
 0x62f   :  { %v1589_v28 = vpop.f32.mrf.mxu1  ;;  %v2185_v29 = vsel %vm449_vm2, %v1976_v23, -inf }
 0x630   :  { %v1740_v20 = vpack.c.bf16 %v1637_v54, %v1589_v28  ;;  %2186 = vmax.xlane.f32.xlu1 %v2185_v29  ;;  %v3874_v22 = vpop.f32.mrf.mxu0  ;;  %v1990_v54 = vsel %vm449_vm2, %v1985_v40, 0 }
 0x631   :  { %v3816_v60 = vpop.f32.mrf.mxu1 }
 0x632   :  { %3843 = vmatmul.mubr.msk.bf16.gmra.mxu1 %vm449_vm2, %v1740_v20  ;;  %v1979_v27 = vpop.f32.mrf.mxu0 }
 0x633   :  { %v1592_v34 = vpop.f32.mrf.mxu1  ;;  %3846 = vmatprep.mubr.msk.bf16.mxu1 %vm4295_vm0, %v4294_v0 }
 0x634   :  { %v3875_v39 = vpop.f32.mrf.mxu0 }
 0x635   :  { %v3817_v24 = vpop.f32.mrf.mxu1 }
 0x636   :  { %v4801_v12 = vpop.f32.mrf.mxu0 }
 0x637   :  { %v1685_v36 = vpop.f32.mrf.mxu1 }
 0x638   :  { %v1741_v31 = vpack.c.bf16 %v1733_v61, %v1685_v36  ;;  %v3886_v32 = vpop.f32.mrf.mxu0  ;;  %v2090_v61 = vsel %vm449_vm2, %v2085_v55, 0 }
 0x639   :  { %v3828_v37 = vpop.f32.mrf.mxu1 }
 0x63a   :  { %3847 = vmatmul.mubr.msk.bf16.gmra.mxu1 %vm449_vm2, %v1741_v31  ;;  %v2079_v38 = vpop.f32.mrf.mxu0 }
 0x63b   :  { %v1688_v42 = vpop.f32.mrf.mxu1  ;;  %3866 = vmatprep.mubr.msk.bf16.mxu1 %vm4295_vm0, %v4294_v0 }
 0x63c   :  { %v3887_v43 = vpop.f32.mrf.mxu0 }
 0x63d   :  { %v3829_v44 = vpop.f32.mrf.mxu1  ;;  %v2191_v43 = vsel %vm449_vm2, %v4801_v12, -inf }
 0x63e   :  { %v4806_v48 = vpop.f32.mrf.mxu0 }
 0x63f   :  { %v2197_v49 = vsel %vm449_vm2, %v4806_v48, -inf }
 0x640   :  { %2198 = vmax.xlane.f32.xlu1 %v2197_v49  ;;  %v3898_v52 = vpop.f32.mrf.mxu0 }
 0x642   :  { %3867 = vmatmul.mubr.msk.bf16.vlgmr.msra.gmra.mxu1 %vm449_vm2, %v1883_v41  ;;  %v2179_v56 = vpop.f32.mrf.mxu0 }
 0x643   :  { %3877 = vmatpush3.bf16.xpose.msra.mxu1 %v1990_v54  ;;  %3878 = vmatprep.mubr.msk.bf16.mxu1 %vm4295_vm0, %v4294_v0 }
 0x644   :  { %v3899_v57 = vpop.f32.mrf.mxu0  ;;  %3888 = vmatprep.subr.bf16.mxu1 %v4294_v0 }
 0x64a   :  { %3879 = vmatmul.mubr.msk.bf16.vlgmr.msra.gmra.mxu1 %vm449_vm2, %v1983_v51 }
 0x64b   :  { %3889 = vmatpush3.bf16.xpose.msra.mxu1 %v2090_v61  ;;  %3890 = vmatprep.mubr.msk.bf16.mxu1 %vm4295_vm0, %v4294_v0 }
 0x64c   :  { %3900 = vmatprep.subr.bf16.mxu1 %v4294_v0 }
 0x652   :  { %3891 = vmatmul.mubr.msk.bf16.vlgmr.msra.gmra.mxu1 %vm449_vm2, %v2083_v63 }
 0x653   :  { %3902 = vmatprep.mubr.msk.bf16.mxu1 %vm4295_vm0, %v4294_v0 }
 0x6b9   :  { %v2187_v62 = vpop.xlane.xlu1 %2186 }
 0x6ba   :  { %v2201_v45 = vsub.f32 %v1976_v23, %v2187_v62 }
 0x6bc   :  { %v2208_v53 = vmul.f32 1.442695, %v2201_v45 }
 0x6be   :  { %4109 = vpow2.f32 %v2208_v53 }
 0x6c1   :  { %v4823_v7 = vpop.f32.mrf.mxu1 }
 0x6c3   :  { %v3840_v2 = vpop.f32.mrf.mxu1 }
 0x6c5   :  { %v4825_v6 = vpop.f32.mrf.mxu1 }
 0x6c7   :  { %v3841_v8 = vpop.f32.mrf.mxu1 }
 0x6c9   :  { %v2199_v63 = vpop.xlane.xlu1 %2198 }
 0x6ca   :  { %v2205_v45 = vsub.f32 %v4806_v48, %v2199_v63 }
 0x6cb   :  { %v4827_v15 = vpop.eup %4109 }
 0x6cc   :  { %v2221_v28 = vsel %vm449_vm2, %v4827_v15, 0.0  ;;  %v2216_v8 = vmul.f32 1.442695, %v2205_v45 }
 0x6cd   :  { %2222 = vadd.xlane.f32.xlu1 %v2221_v28 }
 0x6f2   :  { %v4831_v29 = vpop.f32.mrf.mxu1 }
 0x6f4   :  { %v3844_v20 = vpop.f32.mrf.mxu1 }
 0x6f6   :  { %v4833_v22 = vpop.f32.mrf.mxu1 }
 0x6f8   :  { %v3845_v23 = vpop.f32.mrf.mxu1 }
 0x6fa   :  { %v4835_v60 = vpop.f32.mrf.mxu1 }
 0x6fc   :  { %v3848_v27 = vpop.f32.mrf.mxu1 }
 0x6fe   :  { %v4837_v34 = vpop.f32.mrf.mxu1 }
 0x700   :  { %v3849_v39 = vpop.f32.mrf.mxu1 }
 0x702   :  { %v1926_v41 = vpop.f32.mrf.mxu1 }
 0x703   :  { %v2182_v24 = vsel %vm449_vm2, %v1926_v41, -inf }
 0x704   :  { %2183 = vmax.xlane.f32.xlu0 %v2182_v24  ;;  %v3868_v36 = vpop.f32.mrf.mxu1 }
 0x706   :  { %v1929_v31 = vpop.f32.mrf.mxu1 }
 0x708   :  { %v3869_v32 = vpop.f32.mrf.mxu1 }
 0x70a   :  { %v2026_v37 = vpop.f32.mrf.mxu1 }
 0x70b   :  { %v2188_v38 = vsel %vm449_vm2, %v2026_v37, -inf }
 0x70c   :  { %2189 = vmax.xlane.f32.xlu0 %v2188_v38  ;;  %v3880_v40 = vpop.f32.mrf.mxu1 }
 0x70e   :  { %v2029_v42 = vpop.f32.mrf.mxu1 }
 0x710   :  { %v3881_v44 = vpop.f32.mrf.mxu1  ;;  %2192 = vmax.xlane.f32.xlu0 %v2191_v43 }
 0x712   :  { %v2126_v49 = vpop.f32.mrf.mxu1 }
 0x713   :  { %v2194_v52 = vsel %vm449_vm2, %v2126_v49, -inf }
 0x714   :  { %v3892_v51 = vpop.f32.mrf.mxu1  ;;  %2195 = vmax.xlane.f32.xlu0 %v2194_v52 }
 0x716   :  { %v2129_v54 = vpop.f32.mrf.mxu1 }
 0x718   :  { %v3893_v56 = vpop.f32.mrf.mxu1 }
 0x78d   :  { %v2184_v57 = vpop.xlane.xlu0 %2183 }
 0x78e   :  { %v2200_v55 = vsub.f32 %v1926_v41, %v2184_v57 }
 0x790   :  { %v2206_v61 = vmul.f32 1.442695, %v2200_v55 }
 0x792   :  { %4111 = vpow2.f32 %v2206_v61 }
 0x795   :  { %v2190_v62 = vpop.xlane.xlu0 %2189 }
 0x799   :  { %v2193_v53 = vpop.xlane.xlu0 %2192 }
 0x79a   :  { %v2203_v2 = vsub.f32 %v4801_v12, %v2193_v53  ;;  %v2202_v12 = vsub.f32 %v2026_v37, %v2190_v62 }
 0x79c   :  { %v2212_v28 = vmul.f32 1.442695, %v2203_v2  ;;  %v2210_v36 = vmul.f32 1.442695, %v2202_v12 }
 0x79d   :  { %v2196_v24 = vpop.xlane.xlu0 %2195 }
 0x79e   :  { %4113 = vpow2.f32 %v2212_v28  ;;  %v2204_v31 = vsub.f32 %v2126_v49, %v2196_v24 }
 0x79f   :  { %v4112_v20 = vpop.eup %4111  ;;  %4115 = vpow2.f32 %v2216_v8 }
 0x7a0   :  { %v2218_v23 = vsel %vm449_vm2, %v4112_v20, 0.0  ;;  %4117 = vpow2.f32 %v2210_v36  ;;  %v2214_v32 = vmul.f32 1.442695, %v2204_v31 }
 0x7a1   :  { %2219 = vadd.xlane.f32.xlu0 %v2218_v23 }
 0x7a2   :  { %4119 = vpow2.f32 %v2214_v32 }
 0x7ab   :  { %v4847_v27 = vpop.eup %4113 }
 0x7ac   :  { %v2227_v39 = vsel %vm449_vm2, %v4847_v27, 0.0  ;;  %v4851_v41 = vpop.eup %4115 }
 0x7ad   :  { %2228 = vadd.xlane.f32.xlu1 %v2227_v39  ;;  %v2233_v48 = vsel %vm449_vm2, %v4851_v41, 0.0  ;;  %v4865_v38 = vpop.eup %4117 }
 0x7ae   :  { %v2224_v37 = vsel %vm449_vm2, %v4865_v38, 0.0 }
 0x7af   :  { %v4871_v40 = vpop.eup %4119 }
 0x7b0   :  { %v2230_v42 = vsel %vm449_vm2, %v4871_v40, 0.0 }
 0x7b1   :  { %2234 = vadd.xlane.f32.xlu1 %v2233_v48 }
 0x7b7   :  { %2254 = vrot.lane.b32.xlu0 %v4497_v46, %s4297_s10 }
 0x7c2   :  { %2302 = vrot.lane.b32.xlu1 %v4499_v47, %s4297_s10 }
 0x7c6   :  { %2350 = vrot.lane.b32.xlu1 %v4551_v11, %s4297_s10 }
 0x7ca   :  { %2398 = vrot.lane.b32.xlu1 %v4561_v33, %s4297_s10 }
 0x7ce   :  { %2494 = vrot.lane.b32.xlu1 %v4575_v35, %s4297_s10 }
 0x7d2   :  { %2622 = vrot.lane.b32.xlu1 %v4426_v59, %s4298_s11  ;;  %v2223_v59 = vpop.xlane.xlu1 %2222 }
 0x7d6   :  { %2225 = vadd.xlane.f32.xlu0 %v2224_v37  ;;  %2672 = vrot.lane.b32.xlu1 %v4441_v10, %s4298_s11 }
 0x7da   :  { %2231 = vadd.xlane.f32.xlu0 %v2230_v42  ;;  %2774 = vrot.lane.b32.xlu1 %v4436_v4, %s4298_s11 }
 0x7de   :  { %2772 = vrot.lane.b32.xlu1 %v4450_v17, %s4298_s11 }
 0x7e2   :  { %2874 = vrot.lane.b32.xlu1 %v4454_v19, %s4298_s11 }
 0x7e6   :  { %2872 = vrot.lane.b32.xlu1 %v4473_v25, %s4298_s11 }
 0x7f0   :  { %2446 = vrot.lane.b32.xlu0 %v4571_v30, %s4297_s10 }
 0x7f4   :  { %2624 = vrot.lane.b32.xlu0 %v4416_v50, %s4298_s11 }
 0x7f8   :  { %2674 = vrot.lane.b32.xlu0 %v4424_v58, %s4298_s11 }
 0x7fc   :  { %2724 = vrot.lane.b32.xlu0 %v4434_v3, %s4298_s11 }
 0x800   :  { %2722 = vrot.lane.b32.xlu0 %v4463_v21, %s4298_s11 }
 0x804   :  { %2824 = vrot.lane.b32.xlu0 %v4452_v18, %s4298_s11 }
 0x808   :  { %2822 = vrot.lane.b32.xlu0 %v4480_v26, %s4298_s11 }
 0x82a   :  { %v2220_v4 = vpop.xlane.xlu0 %2219 }
 0x82b   :  { %4121 = vrcp.f32 %v2220_v4  ;;  %v2546_v4 = vld [vmem:[#allocation10 + $0x8] sm:$0xf] }
 0x82c   :  { %4123 = vrcp.f32 %v2223_v59 }
 0x82e   :  { %v2255_v50 = vpop.permute.xlu0 %2254 }
 0x82f   :  { %v2260_v10 = vsel %vm801_vm3, %v2255_v50, 0  ;;  %v2557_v50 = vsel %vm801_vm3, %v2546_v4, 0 }
 0x830   :  { %3901 = vmatpush3.bf16.msra.mxu1 %v2260_v10 }
 0x831   :  { %3912 = vmatprep.subr.bf16.mxu1 %v4294_v0 }
 0x836   :  { %v2229_v58 = vpop.xlane.xlu1 %2228 }
 0x837   :  { %4125 = vrcp.f32 %v2229_v58 }
 0x838   :  { %v4122_v3 = vpop.eup %4121 }
 0x839   :  { %v2242_v17 = vmul.f32 %v4122_v3, %v4112_v20  ;;  %v4124_v19 = vpop.eup %4123 }
 0x83a   :  { %v2235_v21 = vpop.xlane.xlu1 %2234  ;;  %v2243_v25 = vmul.f32 %v4124_v19, %v4827_v15 }
 0x83b   :  { %v2248_v18 = vpack.c.bf16 %v2242_v17, %v2242_v17  ;;  %4127 = vrcp.f32 %v2235_v21 }
 0x83c   :  { %v2249_v44 = vpack.c.bf16 %v2243_v25, %v2243_v25 }
 0x83d   :  { %3903 = vmatmul.mubr.msk.bf16.vlgmr.msra.gmra.mxu1 %vm449_vm2, %v2248_v18 }
 0x83e   :  { %v2303_v26 = vpop.permute.xlu1 %2302  ;;  %3914 = vmatprep.mubr.msk.bf16.mxu1 %vm4295_vm0, %v4294_v0 }
 0x83f   :  { %v2308_v43 = vsel %vm801_vm3, %v2303_v26, 0 }
 0x840   :  { %3907 = vmatpush3.bf16.msra.mxu0 %v2308_v43 }
 0x841   :  { %3918 = vmatprep.subr.bf16.mxu0 %v4294_v0 }
 0x842   :  { %v2351_v49 = vpop.permute.xlu1 %2350 }
 0x843   :  { %v2356_v52 = vsel %vm801_vm3, %v2351_v49, 0  ;;  %3909 = vmatmul.mubr.msk.bf16.vlgmr.msra.gmra.mxu0 %vm449_vm2, %v2249_v44 }
 0x844   :  { %v4126_v51 = vpop.eup %4125  ;;  %3913 = vmatpush3.bf16.msra.mxu1 %v2356_v52  ;;  %3920 = vmatprep.mubr.msk.bf16.mxu0 %vm4295_vm0, %v4294_v0 }
 0x845   :  { %v2245_v15 = vmul.f32 %v4126_v51, %v4847_v27  ;;  %3924 = vmatprep.subr.bf16.mxu1 %v4294_v0 }
 0x846   :  { %v2399_v54 = vpop.permute.xlu1 %2398 }
 0x847   :  { %v2404_v56 = vsel %vm801_vm3, %v2399_v54, 0  ;;  %v2251_v57 = vpack.c.bf16 %v2245_v15, %v2245_v15 }
 0x848   :  { %3919 = vmatpush3.bf16.msra.mxu0 %v2404_v56  ;;  %v4128_v55 = vpop.eup %4127 }
 0x849   :  { %3930 = vmatprep.subr.bf16.mxu0 %v4294_v0  ;;  %v2247_v62 = vmul.f32 %v4128_v55, %v4851_v41 }
 0x84a   :  { %v2495_v61 = vpop.permute.xlu1 %2494 }
 0x84b   :  { %v2500_v63 = vsel %vm801_vm3, %v2495_v61, 0  ;;  %3921 = vmatmul.mubr.msk.bf16.vlgmr.msra.gmra.mxu0 %vm449_vm2, %v2251_v57  ;;  %v2253_v45 = vpack.c.bf16 %v2247_v62, %v2247_v62 }
 0x84c   :  { %3931 = vmatpush3.bf16.msra.mxu0 %v2500_v63  ;;  %3932 = vmatprep.mubr.msk.bf16.mxu0 %vm4295_vm0, %v4294_v0 }
 0x84d   :  { %3950 = vmatprep.subr.bf16.mxu0 %v4294_v0 }
 0x84e   :  { %v2623_v24 = vpop.permute.xlu1 %2622 }
 0x852   :  { %v2673_v37 = vpop.permute.xlu1 %2672 }
 0x853   :  { %3933 = vmatmul.mubr.msk.bf16.vlgmr.msra.gmra.mxu0 %vm449_vm2, %v2253_v45 }
 0x854   :  { %3952 = vmatprep.mubr.msk.bf16.mxu0 %vm4295_vm0, %v4294_v0 }
 0x856   :  { %v2775_v21 = vpop.permute.xlu1 %2774 }
 0x857   :  { %v2780_v44 = vsel %vm449_vm2, %v2775_v21, 0 }
 0x85f   :  { %v2226_v53 = vpop.xlane.xlu0 %2225 }
 0x860   :  { %4129 = vrcp.f32 %v2226_v53 }
 0x863   :  { %v2232_v2 = vpop.xlane.xlu0 %2231 }
 0x864   :  { %4131 = vrcp.f32 %v2232_v2 }
 0x867   :  { %v2447_v8 = vpop.permute.xlu0 %2446 }
 0x868   :  { %v2452_v12 = vsel %vm801_vm3, %v2447_v8, 0 }
 0x86b   :  { %v2625_v28 = vpop.permute.xlu0 %2624 }
 0x86c   :  { %v2630_v20 = vsel %vm449_vm2, %v2625_v28, 0 }
 0x86d   :  { %v4130_v23 = vpop.eup %4129  ;;  %3951 = vmatpush3.bf16.xpose.msra.mxu0 %v2630_v20 }
 0x86e   :  { %v2244_v27 = vmul.f32 %v4130_v23, %v4865_v38  ;;  %3956 = vmatprep.subr.bf16.mxu0 %v4294_v0 }
 0x86f   :  { %v2675_v39 = vpop.permute.xlu0 %2674 }
 0x870   :  { %v2250_v41 = vpack.c.bf16 %v2244_v27, %v2244_v27  ;;  %v2680_v36 = vsel %vm449_vm2, %v2675_v39, 0 }
 0x871   :  { %v4132_v48 = vpop.eup %4131 }
 0x872   :  { %3915 = vmatmul.mubr.msk.bf16.vlgmr.msra.gmra.mxu1 %vm449_vm2, %v2250_v41  ;;  %v2246_v31 = vmul.f32 %v4132_v48, %v4871_v40  ;;  %v2773_v48 = vpop.permute.xlu1 %2772 }
 0x873   :  { %3925 = vmatpush3.bf16.msra.mxu1 %v2452_v12  ;;  %3926 = vmatprep.mubr.msk.bf16.mxu1 %vm4295_vm0, %v4294_v0  ;;  %v2725_v32 = vpop.permute.xlu0 %2724 }
 0x874   :  { %3953 = vmatmul.mubr.msk.bf16.vlgmr.msra.gmra.mxu0 %vm449_vm2, %v2623_v24  ;;  %3936 = vmatprep.subr.bf16.mxu1 %v4294_v0  ;;  %v2252_v38 = vpack.c.bf16 %v2246_v31, %v2246_v31  ;;  %v2730_v59 = vsel %vm449_vm2, %v2725_v32, 0 }
 0x875   :  { %3957 = vmatpush3.bf16.xpose.msra.mxu0 %v2680_v36  ;;  %3958 = vmatprep.mubr.msk.bf16.mxu0 %vm4295_vm0, %v4294_v0 }
 0x876   :  { %3962 = vmatprep.subr.bf16.mxu0 %v4294_v0 }
 0x877   :  { %v2723_v42 = vpop.permute.xlu0 %2722 }
 0x87a   :  { %3927 = vmatmul.mubr.msk.bf16.vlgmr.msra.gmra.mxu1 %vm449_vm2, %v2252_v38 }
 0x87b   :  { %3938 = vmatprep.mubr.msk.bf16.mxu1 %vm4295_vm0, %v4294_v0  ;;  %v2825_v40 = vpop.permute.xlu0 %2824  ;;  %3937 = vmatpush3.bf16.msra.mxu1 %v2557_v50 }
 0x87c   :  { %3959 = vmatmul.mubr.msk.bf16.vlgmr.msra.gmra.mxu0 %vm449_vm2, %v2673_v37  ;;  %v2830_v10 = vsel %vm449_vm2, %v2825_v40, 0  ;;  %3968 = vmatprep.subr.bf16.mxu1 %v4294_v0 }
 0x87d   :  { %3963 = vmatpush3.bf16.xpose.msra.mxu0 %v2730_v59  ;;  %3964 = vmatprep.mubr.msk.bf16.mxu0 %vm4295_vm0, %v4294_v0  ;;  %v2875_v59 = vpop.permute.xlu1 %2874 }
 0x87e   :  { %3974 = vmatprep.subr.bf16.mxu0 %v4294_v0  ;;  %v2880_v50 = vsel %vm449_vm2, %v2875_v59, 0 }
 0x87f   :  { %v2823_v58 = vpop.permute.xlu0 %2822 }
 0x884   :  { %3965 = vmatmul.mubr.msk.bf16.vlgmr.msra.gmra.mxu0 %vm449_vm2, %v2723_v42 }
 0x885   :  { %3975 = vmatpush3.bf16.xpose.msra.mxu0 %v2830_v10  ;;  %3976 = vmatprep.mubr.msk.bf16.mxu0 %vm4295_vm0, %v4294_v0 }
 0x886   :  { %3986 = vmatprep.subr.bf16.mxu0 %v4294_v0 }
 0x88c   :  { %3977 = vmatmul.mubr.msk.bf16.vlgmr.msra.gmra.mxu0 %vm449_vm2, %v2823_v58 }
 0x88d   :  { %3988 = vmatprep.mubr.msk.bf16.mxu0 %vm4295_vm0, %v4294_v0 }
 0x8fd   :  { %v2296_v3 = vpop.f32.mrf.mxu1 }
 0x8ff   :  { %v3904_v17 = vpop.f32.mrf.mxu1 }
 0x901   :  { %v2299_v19 = vpop.f32.mrf.mxu1 }
 0x902   :  { %v2873_v19 = vpop.permute.xlu1 %2872 }
 0x903   :  { %v3905_v18 = vpop.f32.mrf.mxu1  ;;  %v2344_v25 = vpop.f32.mrf.mxu0 }
 0x904   :  { %v2542_v26 = vpack.c.bf16 %v2344_v25, %v2296_v3 }
 0x905   :  { %v3910_v43 = vpop.f32.mrf.mxu0 }
 0x906   :  { %3939 = vmatmul.mubr.msk.bf16.vlgmr.msra.gmra.mxu1 %vm449_vm2, %v2542_v26  ;;  %v1860_v43 = vadd.f32 %v4785_v1, %v4823_v7 }
 0x907   :  { %3969 = vmatpush3.bf16.xpose.msra.mxu1 %v2780_v44  ;;  %v2347_v49 = vpop.f32.mrf.mxu0  ;;  %3942 = vmatprep.mubr.msk.bf16.mxu1 %vm4295_vm0, %v4294_v0 }
 0x908   :  { %3980 = vmatprep.subr.bf16.mxu1 %v4294_v0 }
 0x909   :  { %v3911_v52 = vpop.f32.mrf.mxu0 }
 0x90b   :  { %v2440_v51 = vpop.f32.mrf.mxu0 }
 0x90d   :  { %v3922_v15 = vpop.f32.mrf.mxu0 }
 0x90f   :  { %v2443_v54 = vpop.f32.mrf.mxu0 }
 0x911   :  { %v3923_v56 = vpop.f32.mrf.mxu0 }
 0x913   :  { %v2536_v57 = vpop.f32.mrf.mxu0 }
 0x915   :  { %v3934_v55 = vpop.f32.mrf.mxu0 }
 0x916   :  { %v1868_v55 = vadd.f32 %v4789_v9, %v4831_v29  ;;  %v1876_v9 = vadd.f32 %v4793_v16, %v4835_v60 }
 0x917   :  { %v2539_v61 = vpop.f32.mrf.mxu0 }
 0x919   :  { %v3935_v63 = vpop.f32.mrf.mxu0 }
 0x932   :  { %v2392_v62 = vpop.f32.mrf.mxu1 }
 0x933   :  { %v2543_v45 = vpack.c.bf16 %v2440_v51, %v2392_v62  ;;  %v1863_v51 = vadd.f32 %v4787_v5, %v4825_v6 }
 0x934   :  { %v3916_v53 = vpop.f32.mrf.mxu1  ;;  %v2666_v2 = vpop.f32.mrf.mxu0 }
 0x935   :  { %3943 = vmatmul.mubr.msk.bf16.gmra.mxu1 %vm449_vm2, %v2543_v45  ;;  %v2922_v8 = vsel %vm449_vm2, %v2666_v2, -inf  ;;  %v1871_v53 = vadd.f32 %v4791_v13, %v4833_v22  ;;  %v1879_v13 = vadd.f32 %v4795_v14, %v4837_v34 }
 0x936   :  { %v2395_v28 = vpop.f32.mrf.mxu1  ;;  %2923 = vmax.xlane.f32.xlu0 %v2922_v8  ;;  %v3954_v20 = vpop.f32.mrf.mxu0  ;;  %3946 = vmatprep.mubr.msk.bf16.mxu1 %vm4295_vm0, %v4294_v0 }
 0x938   :  { %v3917_v23 = vpop.f32.mrf.mxu1  ;;  %v2669_v27 = vpop.f32.mrf.mxu0 }
 0x93a   :  { %v2488_v39 = vpop.f32.mrf.mxu1  ;;  %v3955_v41 = vpop.f32.mrf.mxu0 }
 0x93b   :  { %v2544_v12 = vpack.c.bf16 %v2536_v57, %v2488_v39 }
 0x93c   :  { %v3928_v24 = vpop.f32.mrf.mxu1  ;;  %v2716_v36 = vpop.f32.mrf.mxu0 }
 0x93d   :  { %3947 = vmatmul.mubr.msk.bf16.gmra.mxu1 %vm449_vm2, %v2544_v12  ;;  %v2925_v31 = vsel %vm449_vm2, %v2716_v36, -inf }
 0x93e   :  { %v2491_v32 = vpop.f32.mrf.mxu1  ;;  %2926 = vmax.xlane.f32.xlu1 %v2925_v31  ;;  %v3960_v38 = vpop.f32.mrf.mxu0  ;;  %3970 = vmatprep.mubr.msk.bf16.mxu1 %vm4295_vm0, %v4294_v0 }
 0x940   :  { %v3929_v37 = vpop.f32.mrf.mxu1  ;;  %v2719_v42 = vpop.f32.mrf.mxu0 }
 0x942   :  { %v3961_v40 = vpop.f32.mrf.mxu0 }
 0x944   :  { %v2766_v4 = vpop.f32.mrf.mxu0 }
 0x945   :  { %3971 = vmatmul.mubr.msk.bf16.vlgmr.msra.gmra.mxu1 %vm449_vm2, %v2773_v48  ;;  %v2928_v10 = vsel %vm449_vm2, %v2766_v4, -inf }
 0x946   :  { %3981 = vmatpush3.bf16.xpose.msra.mxu1 %v2880_v50  ;;  %2929 = vmax.xlane.f32.xlu0 %v2928_v10  ;;  %v3966_v58 = vpop.f32.mrf.mxu0 }
 0x947   :  { %3982 = vmatprep.mubr.msk.bf16.mxu1 %vm4295_vm0, %v4294_v0  ;;  %3992 = vmatprep.subr.bf16.mxu1 %v4294_v0 }
 0x948   :  { %v2769_v3 = vpop.f32.mrf.mxu0 }
 0x94a   :  { %v3967_v17 = vpop.f32.mrf.mxu0 }
 0x94c   :  { %v4975_v21 = vpop.f32.mrf.mxu0 }
 0x94d   :  { %3983 = vmatmul.mubr.msk.bf16.vlgmr.msra.gmra.mxu1 %vm449_vm2, %v2873_v19  ;;  %v2934_v31 = vsel %vm449_vm2, %v4975_v21, -inf }
 0x94e   :  { %v3978_v18 = vpop.f32.mrf.mxu0  ;;  %3994 = vmatprep.mubr.msk.bf16.mxu1 %vm4295_vm0, %v4294_v0 }
 0x950   :  { %v2869_v25 = vpop.f32.mrf.mxu0 }
 0x952   :  { %v3979_v26 = vpop.f32.mrf.mxu0 }
 0x9bf   :  { %v2924_v57 = vpop.xlane.xlu0 %2923 }
 0x9c0   :  { %v2940_v63 = vsub.f32 %v2666_v2, %v2924_v57 }
 0x9c2   :  { %v2946_v6 = vmul.f32 1.442695, %v2940_v63 }
 0x9c4   :  { %4133 = vpow2.f32 %v2946_v6 }
 0x9c6   :  { %v2593_v44 = vpop.f32.mrf.mxu1 }
 0x9c7   :  { %v4982_v49 = vadd.f32 %v2593_v44, %v1860_v43  ;;  %v2927_v62 = vpop.xlane.xlu1 %2926 }
 0x9c8   :  { %v3940_v52 = vpop.f32.mrf.mxu1  ;;  %v2941_v8 = vsub.f32 %v2716_v36, %v2927_v62 }
 0x9ca   :  { %v2596_v15 = vpop.f32.mrf.mxu1  ;;  %v2948_v29 = vmul.f32 1.442695, %v2941_v8 }
 0x9cb   :  { %v4986_v54 = vadd.f32 %v2596_v15, %v1863_v51 }
 0x9cc   :  { %v3941_v56 = vpop.f32.mrf.mxu1  ;;  %4135 = vpow2.f32 %v2948_v29 }
 0x9cf   :  { %v2930_v1 = vpop.xlane.xlu0 %2929 }
 0x9d0   :  { %v2942_v28 = vsub.f32 %v2766_v4, %v2930_v1 }
 0x9d1   :  { %v5007_v32 = vpop.eup %4133 }
 0x9d2   :  { %v2950_v27 = vmul.f32 1.442695, %v2942_v28  ;;  %v2958_v42 = vsel %vm449_vm2, %v5007_v32, 0.0 }
 0x9d4   :  { %4137 = vpow2.f32 %v2950_v27 }
 0x9d9   :  { %v4136_v34 = vpop.eup %4135 }
 0x9da   :  { %v2961_v50 = vsel %vm449_vm2, %v4136_v34, 0.0 }
 0x9e1   :  { %v5012_v59 = vpop.eup %4137 }
 0x9e2   :  { %v2964_v10 = vsel %vm449_vm2, %v5012_v59, 0.0 }
 0x9f5   :  { %v2601_v61 = vpop.f32.mrf.mxu1 }
 0x9f6   :  { %v4990_v45 = vadd.f32 %v2601_v61, %v1868_v55 }
 0x9f7   :  { %v3944_v7 = vpop.f32.mrf.mxu1 }
 0x9f9   :  { %v2604_v5 = vpop.f32.mrf.mxu1 }
 0x9fa   :  { %v4994_v20 = vadd.f32 %v2604_v5, %v1871_v53 }
 0x9fb   :  { %v3945_v23 = vpop.f32.mrf.mxu1 }
 0x9fd   :  { %v2609_v2 = vpop.f32.mrf.mxu1 }
 0x9fe   :  { %v4998_v39 = vadd.f32 %v2609_v2, %v1876_v9 }
 0x9ff   :  { %v3948_v41 = vpop.f32.mrf.mxu1 }
 0xa01   :  { %v2612_v22 = vpop.f32.mrf.mxu1 }
 0xa02   :  { %v5002_v48 = vadd.f32 %v2612_v22, %v1879_v13 }
 0xa03   :  { %v3949_v12 = vpop.f32.mrf.mxu1 }
 0xa05   :  { %v2816_v24 = vpop.f32.mrf.mxu1 }
 0xa06   :  { %v2931_v36 = vsel %vm449_vm2, %v2816_v24, -inf }
 0xa07   :  { %v3972_v16 = vpop.f32.mrf.mxu1  ;;  %2932 = vmax.xlane.f32.xlu0 %v2931_v36 }
 0xa09   :  { %v2819_v60 = vpop.f32.mrf.mxu1 }
 0xa0b   :  { %v3973_v38 = vpop.f32.mrf.mxu1  ;;  %2935 = vmax.xlane.f32.xlu0 %v2934_v31 }
 0xa0d   :  { %v2916_v14 = vpop.f32.mrf.mxu1 }
 0xa0e   :  { %v2937_v37 = vsel %vm449_vm2, %v2916_v14, -inf }
 0xa0f   :  { %v3984_v40 = vpop.f32.mrf.mxu1  ;;  %2938 = vmax.xlane.f32.xlu1 %v2937_v37  ;;  %2959 = vadd.xlane.f32.xlu0 %v2958_v42 }
 0xa11   :  { %v2919_v4 = vpop.f32.mrf.mxu1 }
 0xa13   :  { %v3985_v58 = vpop.f32.mrf.mxu1  ;;  %2962 = vadd.xlane.f32.xlu1 %v2961_v50  ;;  %2965 = vadd.xlane.f32.xlu0 %v2964_v10  ;;  %v3286_v10 = vld [vmem:[#allocation10 + $0xc] sm:$0xf] }
 0xa14   :  { %v3297_v58 = vsel %vm801_vm3, %v3286_v10, 0 }
 0xa24   :  { %3042 = vrot.lane.b32.xlu1 %v4499_v47, %s4298_s11 }
 0xa28   :  { %3090 = vrot.lane.b32.xlu1 %v4551_v11, %s4298_s11 }
 0xa2c   :  { %3138 = vrot.lane.b32.xlu1 %v4561_v33, %s4298_s11 }
 0xa90   :  { %v2933_v3 = vpop.xlane.xlu0 %2932 }
 0xa91   :  { %v2943_v17 = vsub.f32 %v2816_v24, %v2933_v3 }
 0xa93   :  { %v2952_v19 = vmul.f32 1.442695, %v2943_v17 }
 0xa94   :  { %v2936_v18 = vpop.xlane.xlu0 %2935 }
 0xa95   :  { %4139 = vpow2.f32 %v2952_v19  ;;  %v2944_v25 = vsub.f32 %v4975_v21, %v2936_v18 }
 0xa97   :  { %v2954_v26 = vmul.f32 1.442695, %v2944_v25 }
 0xa98   :  { %v2939_v43 = vpop.xlane.xlu1 %2938  ;;  %v2960_v8 = vpop.xlane.xlu0 %2959 }
 0xa99   :  { %4141 = vpow2.f32 %v2954_v26  ;;  %v2945_v44 = vsub.f32 %v2916_v14, %v2939_v43 }
 0xa9b   :  { %v2956_v52 = vmul.f32 1.442695, %v2945_v44 }
 0xa9c   :  { %v2963_v51 = vpop.xlane.xlu1 %2962  ;;  %v2966_v5 = vpop.xlane.xlu0 %2965 }
 0xa9d   :  { %4143 = vpow2.f32 %v2956_v52 }
 0xa9e   :  { %4145 = vrcp.f32 %v2963_v51 }
 0xa9f   :  { %4147 = vrcp.f32 %v2960_v8  ;;  %v3498_v8 = vld [vmem:[%s5097_s6] ss:$0 sm:$0xff]  ;;  %s4299_s6 = smov [#allocation11]  }
 0xaa0   :  { %v3043_v47 = vpop.permute.xlu1 %3042  ;;  %4149 = vrcp.f32 %v2966_v5  ;;  %s3386_s14 = sshll.u32 %s4299_s6, 4  ;;  %s3387_s14 = int_to_ptr.vmem [resolvable:$true] %s3386_s14 }
 0xaa1   :  { %v3048_v11 = vsel %vm801_vm3, %v3043_v47, 0  ;;  %s4257_s15 = scalar_lea.vmem %s3387_s14, 768  ;;  %p4262_p12 = scmp.lt.s32.totalorder %s3387_s14, %s3387_s14 }
 0xaa2   :  { %v4140_v15 = vpop.eup %4139  ;;  %3993 = vmatpush3.bf16.msra.mxu1 %v3048_v11  ;;  %p4258_p11 = scmp.ne.s32.totalorder %s3387_s14, %s4257_s15  ;;  %p4263_p13 = scmp.lt.s32.totalorder %s4257_s15, %s4257_s15 }
 0xaa3   :  { %v2967_v33 = vsel %vm449_vm2, %v4140_v15, 0.0  ;;  %4004 = vmatprep.subr.bf16.mxu1 %v4294_v0 }
 0xaa4   :  { %2968 = vadd.xlane.f32.xlu1 %v2967_v33  ;;  %v3091_v21 = vpop.permute.xlu1 %3090  ;;  %p4264_p0 = por %p4263_p13, %p4262_p12 }
 0xaa5   :  { %v3096_v27 = vsel %vm801_vm3, %v3091_v21, 0 }
 0xaa6   :  { %v4142_v56 = vpop.eup %4141  ;;  %p4265_p1 = pnand %p4264_p0, %p4258_p11 }
 0xaa7   :  { %v2970_v57 = vsel %vm449_vm2, %v4142_v56, 0.0 }
 0xaa8   :  { %2971 = vadd.xlane.f32.xlu0 %v2970_v57  ;;  %v3139_v1 = vpop.permute.xlu1 %3138 }
 0xaa9   :  { %v3144_v53 = vsel %vm801_vm3, %v3139_v1, 0 }
 0xaaa   :  { %v4144_v55 = vpop.eup %4143 }
 0xaab   :  { %v4146_v61 = vpop.eup %4145  ;;  %v2973_v63 = vsel %vm449_vm2, %v4144_v55, 0.0 }
 0xaac   :  { %v2983_v62 = vmul.f32 %v4146_v61, %v4136_v34  ;;  %2974 = vadd.xlane.f32.xlu1 %v2973_v63  ;;  %v4148_v28 = vpop.eup %4147 }
 0xaad   :  { %v2982_v9 = vmul.f32 %v4148_v28, %v5007_v32 }
 0xaae   :  { %v2989_v7 = vpack.c.bf16 %v2983_v62, %v2983_v62 }
 0xab0   :  { %3995 = vmatmul.mubr.msk.bf16.vlgmr.msra.gmra.mxu1 %vm449_vm2, %v2989_v7 }
 0xab1   :  { %4005 = vmatpush3.bf16.msra.mxu1 %v3144_v53  ;;  %4006 = vmatprep.mubr.msk.bf16.mxu1 %vm4295_vm0, %v4294_v0 }
 0xab2   :  { %4016 = vmatprep.subr.bf16.mxu1 %v4294_v0 }
 0xabd   :  { %3234 = vrot.lane.b32.xlu1 %v4575_v35, %s4298_s11 }
 0xabe   :  { %2994 = vrot.lane.b32.xlu0 %v4497_v46, %s4298_s11  ;;  %v2988_v46 = vpack.c.bf16 %v2982_v9, %v2982_v9 }
 0xac2   :  { %3186 = vrot.lane.b32.xlu0 %v4571_v30, %s4298_s11  ;;  %v4150_v30 = vpop.eup %4149 }
 0xac3   :  { %v2984_v13 = vmul.f32 %v4150_v30, %v5012_v59 }
 0xac5   :  { %v2990_v16 = vpack.c.bf16 %v2984_v13, %v2984_v13 }
 0xb2d   :  { %v2969_v6 = vpop.xlane.xlu1 %2968 }
 0xb2e   :  { %4151 = vrcp.f32 %v2969_v6 }
 0xb31   :  { %v2972_v23 = vpop.xlane.xlu0 %2971 }
 0xb32   :  { %4153 = vrcp.f32 %v2972_v23 }
 0xb35   :  { %v2975_v29 = vpop.xlane.xlu1 %2974  ;;  %v2995_v2 = vpop.permute.xlu0 %2994 }
 0xb36   :  { %4155 = vrcp.f32 %v2975_v29  ;;  %v3000_v35 = vsel %vm801_vm3, %v2995_v2, 0 }
 0xb37   :  { %3987 = vmatpush3.bf16.msra.mxu0 %v3000_v35 }
 0xb38   :  { %3998 = vmatprep.subr.bf16.mxu0 %v4294_v0 }
 0xb39   :  { %v3235_v12 = vpop.permute.xlu1 %3234  ;;  %v3187_v36 = vpop.permute.xlu0 %3186 }
 0xb3a   :  { %3989 = vmatmul.mubr.msk.bf16.vlgmr.msra.gmra.mxu0 %vm449_vm2, %v2988_v46  ;;  %v3240_v60 = vsel %vm801_vm3, %v3235_v12, 0  ;;  %v3192_v32 = vsel %vm801_vm3, %v3187_v36, 0 }
 0xb3b   :  { %v4152_v41 = vpop.eup %4151  ;;  %3999 = vmatpush3.bf16.msra.mxu0 %v3096_v27  ;;  %4000 = vmatprep.mubr.msk.bf16.mxu0 %vm4295_vm0, %v4294_v0 }
 0xb3c   :  { %v2985_v22 = vmul.f32 %v4152_v41, %v4140_v15  ;;  %4010 = vmatprep.subr.bf16.mxu0 %v4294_v0 }
 0xb3e   :  { %v2991_v24 = vpack.c.bf16 %v2985_v22, %v2985_v22 }
 0xb3f   :  { %v4154_v31 = vpop.eup %4153 }
 0xb40   :  { %4007 = vmatmul.mubr.msk.bf16.vlgmr.msra.gmra.mxu1 %vm449_vm2, %v2991_v24  ;;  %v2986_v14 = vmul.f32 %v4154_v31, %v4142_v56 }
 0xb41   :  { %4017 = vmatpush3.bf16.msra.mxu1 %v3240_v60  ;;  %4018 = vmatprep.mubr.msk.bf16.mxu1 %vm4295_vm0, %v4294_v0 }
 0xb42   :  { %4001 = vmatmul.mubr.msk.bf16.vlgmr.msra.gmra.mxu0 %vm449_vm2, %v2990_v16  ;;  %v2992_v42 = vpack.c.bf16 %v2986_v14, %v2986_v14 }
 0xb43   :  { %v4156_v38 = vpop.eup %4155  ;;  %4011 = vmatpush3.bf16.msra.mxu0 %v3192_v32  ;;  %4012 = vmatprep.mubr.msk.bf16.mxu0 %vm4295_vm0, %v4294_v0 }
 0xb44   :  { %v2987_v34 = vmul.f32 %v4156_v38, %v4144_v55  ;;  %4022 = vmatprep.subr.bf16.mxu0 %v4294_v0 }
 0xb46   :  { %v2993_v37 = vpack.c.bf16 %v2987_v34, %v2987_v34 }
 0xb48   :  { %4019 = vmatmul.mubr.msk.bf16.vlgmr.msra.gmra.mxu1 %vm449_vm2, %v2993_v37 }
 0xb4a   :  { %4013 = vmatmul.mubr.msk.bf16.vlgmr.msra.gmra.mxu0 %vm449_vm2, %v2992_v42 }
 0xb4b   :  { %4024 = vmatprep.mubr.msk.bf16.mxu0 %vm4295_vm0, %v4294_v0  ;;  %4023 = vmatpush3.bf16.msra.mxu0 %v3297_v58 }
 0xb70   :  { %v3084_v59 = vpop.f32.mrf.mxu1 }
 0xb72   :  { %v3996_v40 = vpop.f32.mrf.mxu1 }
 0xb74   :  { %v3087_v4 = vpop.f32.mrf.mxu1 }
 0xb76   :  { %v3997_v50 = vpop.f32.mrf.mxu1 }
 0xbfa   :  { %v3036_v3 = vpop.f32.mrf.mxu0 }
 0xbfb   :  { %v3282_v17 = vpack.c.bf16 %v3084_v59, %v3036_v3 }
 0xbfc   :  { %v3990_v19 = vpop.f32.mrf.mxu0 }
 0xbfd   :  { %4025 = vmatmul.mubr.msk.bf16.vlgmr.msra.gmra.mxu0 %vm449_vm2, %v3282_v17 }
 0xbfe   :  { %v3039_v18 = vpop.f32.mrf.mxu0  ;;  %4028 = vmatprep.mubr.msk.bf16.mxu0 %vm4295_vm0, %v4294_v0 }
 0xc00   :  { %v3991_v25 = vpop.f32.mrf.mxu0  ;;  %v3180_v26 = vpop.f32.mrf.mxu1 }
 0xc02   :  { %v3132_v43 = vpop.f32.mrf.mxu0  ;;  %v4008_v44 = vpop.f32.mrf.mxu1 }
 0xc03   :  { %v3283_v52 = vpack.c.bf16 %v3180_v26, %v3132_v43 }
 0xc04   :  { %v4002_v51 = vpop.f32.mrf.mxu0  ;;  %v3183_v47 = vpop.f32.mrf.mxu1 }
 0xc05   :  { %4029 = vmatmul.mubr.msk.bf16.gmra.mxu0 %vm449_vm2, %v3283_v52 }
 0xc06   :  { %v3135_v11 = vpop.f32.mrf.mxu0  ;;  %v4009_v15 = vpop.f32.mrf.mxu1  ;;  %4032 = vmatprep.mubr.msk.bf16.mxu0 %vm4295_vm0, %v4294_v0 }
 0xc08   :  { %v4003_v33 = vpop.f32.mrf.mxu0  ;;  %v3276_v56 = vpop.f32.mrf.mxu1 }
 0xc0a   :  { %v3228_v21 = vpop.f32.mrf.mxu0  ;;  %v4020_v57 = vpop.f32.mrf.mxu1 }
 0xc0b   :  { %v3284_v55 = vpack.c.bf16 %v3276_v56, %v3228_v21 }
 0xc0c   :  { %v4014_v61 = vpop.f32.mrf.mxu0  ;;  %v3279_v63 = vpop.f32.mrf.mxu1 }
 0xc0d   :  { %4033 = vmatmul.mubr.msk.bf16.gmra.mxu0 %vm449_vm2, %v3284_v55 }
 0xc0e   :  { %v3231_v62 = vpop.f32.mrf.mxu0  ;;  %v4021_v1 = vpop.f32.mrf.mxu1 }
 0xc10   :  { %v4015_v7 = vpop.f32.mrf.mxu0 }
 0xcbd   :  { %v3333_v53 = vpop.f32.mrf.mxu0 }
 0xcbe   :  { %v3356_v5 = vadd.f32 %v3333_v53, %v4982_v49 }
 0xcbf   :  { %v4026_v0 = vpop.f32.mrf.mxu0 }
 0xcc0   :  { %v3369_v6 = vadd.f32 %v3498_v8, %v3356_v5 }
 0xcc1   :  { %v3336_v28 = vpop.f32.mrf.mxu0 }
 0xcc2   :  { %3375 = vst.msk [vmem:[#allocation11] sm:$0xff] %vm146_vm1, %v3369_v6  ;;  %v3357_v23 = vadd.f32 %v3336_v28, %v4986_v54 }
 0xcc3   :  { %v4027_v9 = vpop.f32.mrf.mxu0 }
 0xcc4   :  { %v3370_v29 = vadd.f32 %v3498_v8, %v3357_v23 }
 0xcc5   :  { %v3341_v2 = vpop.f32.mrf.mxu0 }
 0xcc6   :  { %3376 = vst.msk [vmem:[#allocation11 + $0x8] sm:$0xff] %vm146_vm1, %v3370_v29  ;;  %v3358_v35 = vadd.f32 %v3341_v2, %v4990_v45 }
 0xcc7   :  { %v4030_v46 = vpop.f32.mrf.mxu0 }
 0xcc8   :  { %v3371_v30 = vadd.f32 %v3498_v8, %v3358_v35 }
 0xcc9   :  { %v3344_v27 = vpop.f32.mrf.mxu0 }
 0xcca   :  { %3377 = vst.msk [vmem:[#allocation11 + $0x10] sm:$0xff] %vm146_vm1, %v3371_v30  ;;  %v3359_v49 = vadd.f32 %v3344_v27, %v4994_v20 }
 0xccb   :  { %v4031_v41 = vpop.f32.mrf.mxu0 }
 0xccc   :  { %v3372_v13 = vadd.f32 %v3498_v8, %v3359_v49 }
 0xccd   :  { %v3349_v22 = vpop.f32.mrf.mxu0 }
 0xcce   :  { %3378 = vst.msk [vmem:[#allocation11 + $0x18] sm:$0xff] %vm146_vm1, %v3372_v13  ;;  %v3360_v54 = vadd.f32 %v3349_v22, %v4998_v39 }
 0xccf   :  { %v4034_v12 = vpop.f32.mrf.mxu0 }
 0xcd0   :  { %v3373_v24 = vadd.f32 %v3498_v8, %v3360_v54 }
 0xcd1   :  { %v3352_v36 = vpop.f32.mrf.mxu0 }
 0xcd2   :  { %3379 = vst.msk [vmem:[#allocation11 + $0x20] sm:$0xff] %vm146_vm1, %v3373_v24  ;;  %v3361_v45 = vadd.f32 %v3352_v36, %v5002_v48 }
 0xcd3   :  { %v4035_v16 = vpop.f32.mrf.mxu0 }
 0xcd4   :  { %v3374_v60 = vadd.f32 %v3498_v8, %v3361_v45 }
 0xcd6   :  { %3380 = vst.msk [vmem:[#allocation11 + $0x28] sm:$0xff] %vm146_vm1, %v3374_v60 }
 0xcd7   :  { %4268 = shalt.err (!%p4265_p1)
}
 0xcd8   :  { %3392 = dma.vmem_to_hbm [thread:$0]  %s3387_s14, 768, %s5098_s7, [#allocation4], %s4287_s29, %s4287_s29, %s4288_s30  }
 0xcd9   :  { %4283 = dma.done.wait [#allocation4], 768  }
 0xcda   :  { %4284 = vsyncadd [#allocation4], 4294966528 }
 0xcdb   :  { %3396 = vsyncpa [#allocation3], 1 }
 0xcdc   :  { %3397 = vsyncpa [#allocation6], 1 }
 0xcdd   :  { %3398 = vsyncpa [#allocation9], 1 }
 0xcde   :  { %3399 = vsyncpa [#allocation4], 1 }

</bundles_post_ra>
